<compile_context>
chip_gen: v6e
topology: v6e:2x2x1
jax: 0.10.0
libtpu: 0.0.40
codegen_flags: <defaults>
</compile_context>

<pallas_src>
import jax
import jax.numpy as jnp
from jax.experimental import pallas as pl
from jax.experimental.pallas import tpu as pltpu

QAT_WEIGHT = 0.2

_TM = 128       # token-row tile (TODO(synk): raise to 256 on v6e/v7x after VMEM re-check)
_TN_MAX = 512   # vocab tile width for the online-LSE sweep
_LANE = 128
_NEG = -1e30    # python float (NOT a jnp array -> nothing captured by the kernel)


def _round_up(x, m):
    return (x + m - 1) // m * m


def _make_kernel(regular_weight, qat_weight, tn):
    """regular_weight / qat_weight / tn are Python scalars (compile-time)."""

    def kernel(deq_ref, x_ref, xq_ref, wf_ref, wq_ref, b_ref, lab_ref,
               logits_ref, ploss_ref,
               m_r, l_r, a_r, m_q, l_q, a_q):
        j = pl.program_id(1)                       # vocab step (reduction axis)

        @pl.when(j == 0)
        def _init():
            m_r[...] = jnp.full(m_r.shape, _NEG, jnp.float32)
            l_r[...] = jnp.zeros_like(l_r)
            a_r[...] = jnp.zeros_like(a_r)
            m_q[...] = jnp.full(m_q.shape, _NEG, jnp.float32)
            l_q[...] = jnp.zeros_like(l_q)
            a_q[...] = jnp.zeros_like(a_q)
            ploss_ref[...] = jnp.zeros_like(ploss_ref)

        labels = lab_ref[...]                      # [TM, 1] i32 (-1 on padded rows)
        bias = b_ref[...]                          # [1, TN] f32 (-1e30 on padded cols)
        tm = labels.shape[0]
        col = jax.lax.broadcasted_iota(jnp.int32, (tm, tn), 1) + j * tn
        lab_hit = col == labels                    # labels < V -> never a padded col

        def online_update(logits, m_ref, l_ref, a_ref):
            m_new = jnp.maximum(m_ref[...],
                                jnp.max(logits, axis=-1, keepdims=True))
            alpha = jnp.exp(m_ref[...] - m_new)
            l_ref[...] = alpha * l_ref[...] + jnp.sum(
                jnp.exp(logits - m_new), axis=-1, keepdims=True)
            a_ref[...] += jnp.sum(jnp.where(lab_hit, logits, 0.0),
                                  axis=-1, keepdims=True)
            m_ref[...] = m_new

        # ---- regular branch: bf16 MXU operands, f32 accumulation ------------
        # Branches are consumed sequentially so only one [TM, TN] f32 tile plus
        # its exp intermediates is live at a time (lower scratch/spill pressure).
        logits = jnp.dot(x_ref[...], wf_ref[...],
                         preferred_element_type=jnp.float32) + bias
        logits_ref[...] = logits.astype(logits_ref.dtype)   # bf16 writeback
        online_update(logits, m_r, l_r, a_r)

        # ---- QAT branch: exact int8 levels (in bf16) through the MXU --------
        # TODO(synk): on v5e/v6e use a true int8 MXU path (int8 operands,
        # preferred_element_type=int32) for ~2x matmul throughput; not on v7x.
        logits_q = jnp.dot(xq_ref[...], wq_ref[...],
                           preferred_element_type=jnp.float32) * deq_ref[0] + bias
        online_update(logits_q, m_q, l_q, a_q)

        @pl.when(j == pl.num_programs(1) - 1)
        def _finalize():
            nll_r = m_r[...] + jnp.log(l_r[...]) - a_r[...]
            nll_q = m_q[...] + jnp.log(l_q[...]) - a_q[...]
            mixed = regular_weight * nll_r + qat_weight * nll_q
            row_ok = labels >= 0                   # drop padded rows
            ploss_ref[...] = jnp.where(row_ok, mixed, 0.0)

    return kernel


def mixed_qat_forward(input_ids, labels, embed_table, w, b,
                      qat_weight=QAT_WEIGHT):
    """input_ids, labels: [B, S] int32.  Returns (mixed_loss, logits [B,S,V])."""
    B, S = input_ids.shape
    V, H = embed_table.shape
    N = B * S

    tn = min(_TN_MAX, _round_up(V, _LANE))         # lane-aligned vocab tile
    v_pad = _round_up(V, tn)
    n_pad = _round_up(max(N, _TM), _TM)
    grid_m = n_pad // _TM
    grid_v = v_pad // tn

    # ---- plain-JAX glue: embedding gather + hoisted fake-quant pre-pass -----
    x = embed_table[input_ids.reshape(-1)].astype(jnp.float32)     # [N, H]
    w32 = w.astype(jnp.float32)                                    # [H, V]

    sx = jnp.maximum(jnp.max(jnp.abs(x)) / 127.0, 1e-8)            # act scale
    sw = jnp.maximum(jnp.max(jnp.abs(w32)) / 127.0, 1e-8)          # wgt scale
    xq_lvl = jnp.clip(jnp.round(x / sx), -127.0, 127.0)            # int levels
    wq_lvl = jnp.clip(jnp.round(w32 / sw), -127.0, 127.0)
    deq = (sx * sw).reshape(1).astype(jnp.float32)                 # SMEM scalar

    # ---- pad to MXU / lane friendly shapes (bf16 operands halve DMA bytes) --
    x_p = jnp.zeros((n_pad, H), jnp.bfloat16).at[:N].set(x.astype(jnp.bfloat16))
    xq_p = jnp.zeros((n_pad, H), jnp.bfloat16).at[:N].set(
        xq_lvl.astype(jnp.bfloat16))
    lab_p = jnp.full((n_pad, 1), -1, jnp.int32).at[:N, 0].set(
        labels.reshape(-1).astype(jnp.int32))
    wf_p = jnp.zeros((H, v_pad), jnp.bfloat16).at[:, :V].set(
        w32.astype(jnp.bfloat16))
    wq_p = jnp.zeros((H, v_pad), jnp.bfloat16).at[:, :V].set(
        wq_lvl.astype(jnp.bfloat16))
    # -1e30 bias on padded columns replaces any in-kernel vocab mask.
    b_p = jnp.full((1, v_pad), _NEG, jnp.float32).at[0, :V].set(
        b.astype(jnp.float32))

    kernel = _make_kernel(1.0 - qat_weight, qat_weight, tn)

    logits_p, ploss = pl.pallas_call(
        kernel,
        out_shape=(
            jax.ShapeDtypeStruct((n_pad, v_pad), jnp.bfloat16),    # logits
            jax.ShapeDtypeStruct((n_pad, 1), jnp.float32),         # per-row loss
        ),
        grid_spec=pltpu.PrefetchScalarGridSpec(
            num_scalar_prefetch=0,
            grid=(grid_m, grid_v),
            in_specs=[
                pl.BlockSpec(memory_space=pltpu.MemorySpace.SMEM),  # dequant scale
                pl.BlockSpec((_TM, H), lambda i, j: (i, 0)),        # x rows (bf16)
                pl.BlockSpec((_TM, H), lambda i, j: (i, 0)),        # xq levels
                pl.BlockSpec((H, tn), lambda i, j: (0, j)),         # w  vocab tile
                pl.BlockSpec((H, tn), lambda i, j: (0, j)),         # wq vocab tile
                pl.BlockSpec((1, tn), lambda i, j: (0, j)),         # bias tile
                pl.BlockSpec((_TM, 1), lambda i, j: (i, 0)),        # labels
            ],
            out_specs=(
                pl.BlockSpec((_TM, tn), lambda i, j: (i, j)),       # logits (bf16)
                pl.BlockSpec((_TM, 1), lambda i, j: (i, 0)),        # per-row loss
            ),
            scratch_shapes=[pltpu.VMEM((_TM, 1), jnp.float32)] * 6,
        ),
        compiler_params=pltpu.CompilerParams(
            # Rows are independent (-> v7x's 2 TCs can split them); vocab is
            # the reduction axis (online LSE + resident per-row loss block).
            dimension_semantics=("parallel", "arbitrary"),
            vmem_limit_bytes=48 * 1024 * 1024,
        ),
    )(deq, x_p, xq_p, wf_p, wq_p, b_p, lab_p)

    loss = jnp.sum(ploss) / float(N)
    logits = logits_p[:N, :V].astype(jnp.float32).reshape(B, S, V)
    return loss, logits


def _reference_forward(input_ids, labels, embed_table, w, b,
                       qat_weight=QAT_WEIGHT):
    """Pure-JAX f32 reference for the tiny LM + MixedQAT loss mixing."""
    B, S = input_ids.shape
    V, H = embed_table.shape
    x = embed_table[input_ids.reshape(-1)].astype(jnp.float32)
    w32 = w.astype(jnp.float32)
    lab = labels.reshape(-1, 1).astype(jnp.int32)

    def fq(t):
        s = jnp.maximum(jnp.max(jnp.abs(t)) / 127.0, 1e-8)
        return jnp.clip(jnp.round(t / s), -127.0, 127.0) * s

    def ce(logits):
        m = jnp.max(logits, axis=-1, keepdims=True)
        lse = m + jnp.log(jnp.sum(jnp.exp(logits - m), axis=-1, keepdims=True))
        lab_logit = jnp.take_along_axis(logits, lab, axis=-1)
        return jnp.mean(lse - lab_logit)

    logits = x @ w32 + b.astype(jnp.float32)
    logits_q = fq(x) @ fq(w32) + b.astype(jnp.float32)
    loss = (1.0 - qat_weight) * ce(logits) + qat_weight * ce(logits_q)
    return loss, logits.reshape(B, S, V)


if __name__ == "__main__":
    # Small shapes implied by the forward: batch=2, seq=8, hidden=32, vocab=32.
    B, S, H, V = 2, 8, 32, 32

    key = jax.random.PRNGKey(0)
    k_emb, k_w, k_b, k_ids, k_lbl = jax.random.split(key, 5)

    embed_table = jax.random.normal(k_emb, (V, H), dtype=jnp.float32) * 0.1
    w = jax.random.normal(k_w, (H, V), dtype=jnp.float32) * 0.1
    b = jax.random.normal(k_b, (V,), dtype=jnp.float32) * 0.01

    input_ids = jax.random.randint(k_ids, (B, S), 0, V, dtype=jnp.int32)
    labels = jax.random.randint(k_lbl, (B, S), 0, V, dtype=jnp.int32)

    loss, logits = jax.jit(mixed_qat_forward)(input_ids, labels,
                                              embed_table, w, b)
    jax.block_until_ready((loss, logits))

    ref_loss, ref_logits = _reference_forward(input_ids, labels,
                                              embed_table, w, b)

    assert logits.shape == (B, S, V)
    assert bool(jnp.isfinite(loss))
    # bf16 MXU operands / bf16 logits writeback -> loose tolerance vs f32 ref.
    assert jnp.allclose(loss, ref_loss, atol=2e-2, rtol=2e-2)
    assert jnp.allclose(logits, ref_logits, atol=2e-2)

    # TODO(synk): eval-mode branch (return qat_outputs) not exposed; only the
    # training-mode mixed-loss path is implemented in the kernel.
    print("KERNEL_OK")
</pallas_src>

<mosaic_0001>
module attributes {stable_mosaic.version = 11 : i64} {
  func.func @kernel(%arg0: i32, %arg1: i32, %arg2: memref<1xf32, #tpu.memory_space<smem>>, %arg3: memref<128x32xbf16, #tpu.memory_space<vmem>>, %arg4: memref<128x32xbf16, #tpu.memory_space<vmem>>, %arg5: memref<32x128xbf16, #tpu.memory_space<vmem>>, %arg6: memref<32x128xbf16, #tpu.memory_space<vmem>>, %arg7: memref<1x128xf32, #tpu.memory_space<vmem>>, %arg8: memref<128x1xi32, #tpu.memory_space<vmem>>, %arg9: memref<128x128xbf16, #tpu.memory_space<vmem>>, %arg10: memref<128x1xf32, #tpu.memory_space<vmem>>, %arg11: memref<128x1xf32, #tpu.memory_space<vmem>>, %arg12: memref<128x1xf32, #tpu.memory_space<vmem>>, %arg13: memref<128x1xf32, #tpu.memory_space<vmem>>, %arg14: memref<128x1xf32, #tpu.memory_space<vmem>>, %arg15: memref<128x1xf32, #tpu.memory_space<vmem>>, %arg16: memref<128x1xf32, #tpu.memory_space<vmem>>) attributes {dimension_semantics = [#tpu.dimension_semantics<parallel>, #tpu.dimension_semantics<arbitrary>], iteration_bounds = array<i64: 1, 1>, scalar_prefetch = 0 : i64, scratch_operands = 6 : i64, tpu.core_type = #tpu.core_type<tc>, window_params = [{transform_indices = @transform_0, window_bounds = array<i64: 1>}, {transform_indices = @transform_1, window_bounds = array<i64: 128, 32>}, {transform_indices = @transform_2, window_bounds = array<i64: 128, 32>}, {transform_indices = @transform_3, window_bounds = array<i64: 32, 128>}, {transform_indices = @transform_4, window_bounds = array<i64: 32, 128>}, {transform_indices = @transform_5, window_bounds = array<i64: 1, 128>}, {transform_indices = @transform_6, window_bounds = array<i64: 128, 1>}, {transform_indices = @transform_7, window_bounds = array<i64: 128, 128>}, {transform_indices = @transform_8, window_bounds = array<i64: 128, 1>}]} {
    %c0_i32 = arith.constant 0 : i32
    %0 = arith.cmpi eq, %arg1, %c0_i32 : i32
    %1 = arith.extui %0 : i1 to i32
    %c0_i32_0 = arith.constant 0 : i32
    %2 = arith.cmpi ne, %1, %c0_i32_0 : i32
    scf.if %2 {
      %cst_54 = arith.constant -1.000000e+30 : f32
      %77 = vector.broadcast %cst_54 : f32 to vector<128x1xf32>
      %c0_55 = arith.constant 0 : index
      %c0_56 = arith.constant 0 : index
      %78 = vector.load %arg11[%c0_55, %c0_56] : memref<128x1xf32, #tpu.memory_space<vmem>>, vector<128x1xf32>
      tpu.vector_store %arg11[%c0_55, %c0_56], %77 {strides = array<i32>} : memref<128x1xf32, #tpu.memory_space<vmem>>, vector<128x1xf32>,
      %cst_57 = arith.constant 0.000000e+00 : f32
      %79 = vector.broadcast %cst_57 : f32 to vector<128x1xf32>
      %c0_58 = arith.constant 0 : index
      %c0_59 = arith.constant 0 : index
      %80 = vector.load %arg12[%c0_58, %c0_59] : memref<128x1xf32, #tpu.memory_space<vmem>>, vector<128x1xf32>
      tpu.vector_store %arg12[%c0_58, %c0_59], %79 {strides = array<i32>} : memref<128x1xf32, #tpu.memory_space<vmem>>, vector<128x1xf32>,
      %cst_60 = arith.constant 0.000000e+00 : f32
      %81 = vector.broadcast %cst_60 : f32 to vector<128x1xf32>
      %c0_61 = arith.constant 0 : index
      %c0_62 = arith.constant 0 : index
      %82 = vector.load %arg13[%c0_61, %c0_62] : memref<128x1xf32, #tpu.memory_space<vmem>>, vector<128x1xf32>
      tpu.vector_store %arg13[%c0_61, %c0_62], %81 {strides = array<i32>} : memref<128x1xf32, #tpu.memory_space<vmem>>, vector<128x1xf32>,
      %cst_63 = arith.constant -1.000000e+30 : f32
      %83 = vector.broadcast %cst_63 : f32 to vector<128x1xf32>
      %c0_64 = arith.constant 0 : index
      %c0_65 = arith.constant 0 : index
      %84 = vector.load %arg14[%c0_64, %c0_65] : memref<128x1xf32, #tpu.memory_space<vmem>>, vector<128x1xf32>
      tpu.vector_store %arg14[%c0_64, %c0_65], %83 {strides = array<i32>} : memref<128x1xf32, #tpu.memory_space<vmem>>, vector<128x1xf32>,
      %cst_66 = arith.constant 0.000000e+00 : f32
      %85 = vector.broadcast %cst_66 : f32 to vector<128x1xf32>
      %c0_67 = arith.constant 0 : index
      %c0_68 = arith.constant 0 : index
      %86 = vector.load %arg15[%c0_67, %c0_68] : memref<128x1xf32, #tpu.memory_space<vmem>>, vector<128x1xf32>
      tpu.vector_store %arg15[%c0_67, %c0_68], %85 {strides = array<i32>} : memref<128x1xf32, #tpu.memory_space<vmem>>, vector<128x1xf32>,
      %cst_69 = arith.constant 0.000000e+00 : f32
      %87 = vector.broadcast %cst_69 : f32 to vector<128x1xf32>
      %c0_70 = arith.constant 0 : index
      %c0_71 = arith.constant 0 : index
      %88 = vector.load %arg16[%c0_70, %c0_71] : memref<128x1xf32, #tpu.memory_space<vmem>>, vector<128x1xf32>
      tpu.vector_store %arg16[%c0_70, %c0_71], %87 {strides = array<i32>} : memref<128x1xf32, #tpu.memory_space<vmem>>, vector<128x1xf32>,
      %cst_72 = arith.constant 0.000000e+00 : f32
      %89 = vector.broadcast %cst_72 : f32 to vector<128x1xf32>
      %c0_73 = arith.constant 0 : index
      %c0_74 = arith.constant 0 : index
      %90 = vector.load %arg10[%c0_73, %c0_74] : memref<128x1xf32, #tpu.memory_space<vmem>>, vector<128x1xf32>
      tpu.vector_store %arg10[%c0_73, %c0_74], %89 {strides = array<i32>} : memref<128x1xf32, #tpu.memory_space<vmem>>, vector<128x1xf32>,
    } else {
    }
    %c0 = arith.constant 0 : index
    %c0_1 = arith.constant 0 : index
    %3 = vector.load %arg8[%c0, %c0_1] : memref<128x1xi32, #tpu.memory_space<vmem>>, vector<128x1xi32>
    %c0_2 = arith.constant 0 : index
    %c0_3 = arith.constant 0 : index
    %4 = vector.load %arg7[%c0_2, %c0_3] : memref<1x128xf32, #tpu.memory_space<vmem>>, vector<1x128xf32>
    %5 = tpu.iota {dimensions = array<i32: 1>} : vector<128x128xi32>
    %c128_i32 = arith.constant 128 : i32
    %6 = arith.muli %arg1, %c128_i32 : i32
    %7 = vector.broadcast %6 : i32 to vector<128x128xi32>
    %8 = arith.addi %5, %7 : vector<128x128xi32>
    %9 = vector.broadcast %3 : vector<128x1xi32> to vector<128x128xi32>
    %10 = arith.cmpi eq, %8, %9 : vector<128x128xi32>
    %c0_4 = arith.constant 0 : index
    %c0_5 = arith.constant 0 : index
    %11 = vector.load %arg3[%c0_4, %c0_5] : memref<128x32xbf16, #tpu.memory_space<vmem>>, vector<128x32xbf16>
    %c0_6 = arith.constant 0 : index
    %c0_7 = arith.constant 0 : index
    %12 = vector.load %arg5[%c0_6, %c0_7] : memref<32x128xbf16, #tpu.memory_space<vmem>>, vector<32x128xbf16>
    %cst = arith.constant dense<0.000000e+00> : vector<128x128xf32>
    %13 = tpu.matmul %11, %12, %cst {dimension_numbers = #tpu.dot_dimension_numbers<[1], [0], [0], [1], [0, 0, 1, 1], [], []>} : vector<128x32xbf16>, vector<32x128xbf16>, vector<128x128xf32> -> vector<128x128xf32>
    %14 = vector.broadcast %4 : vector<1x128xf32> to vector<128x128xf32>
    %15 = arith.addf %13, %14 : vector<128x128xf32>
    %16 = arith.truncf %15 : vector<128x128xf32> to vector<128x128xbf16>
    %c0_8 = arith.constant 0 : index
    %c0_9 = arith.constant 0 : index
    %17 = vector.load %arg9[%c0_8, %c0_9] : memref<128x128xbf16, #tpu.memory_space<vmem>>, vector<128x128xbf16>
    tpu.vector_store %arg9[%c0_8, %c0_9], %16 {strides = array<i32>} : memref<128x128xbf16, #tpu.memory_space<vmem>>, vector<128x128xbf16>,
    %c0_10 = arith.constant 0 : index
    %c0_11 = arith.constant 0 : index
    %18 = vector.load %arg11[%c0_10, %c0_11] : memref<128x1xf32, #tpu.memory_space<vmem>>, vector<128x1xf32>
    %cst_12 = arith.constant dense<0xFF800000> : vector<128xf32>
    %19 = vector.multi_reduction <maximumf>, %15, %cst_12 [1] : vector<128x128xf32> to vector<128xf32>
    %20 = vector.shape_cast %19 : vector<128xf32> to vector<128x1xf32>
    %21 = arith.maximumf %18, %20 : vector<128x1xf32>
    %c0_13 = arith.constant 0 : index
    %c0_14 = arith.constant 0 : index
    %22 = vector.load %arg11[%c0_13, %c0_14] : memref<128x1xf32, #tpu.memory_space<vmem>>, vector<128x1xf32>
    %23 = arith.subf %22, %21 : vector<128x1xf32>
    %24 = math.exp %23 : vector<128x1xf32>
    %c0_15 = arith.constant 0 : index
    %c0_16 = arith.constant 0 : index
    %25 = vector.load %arg12[%c0_15, %c0_16] : memref<128x1xf32, #tpu.memory_space<vmem>>, vector<128x1xf32>
    %26 = arith.mulf %24, %25 : vector<128x1xf32>
    %27 = vector.broadcast %21 : vector<128x1xf32> to vector<128x128xf32>
    %28 = arith.subf %15, %27 : vector<128x128xf32>
    %29 = math.exp %28 : vector<128x128xf32>
    %cst_17 = arith.constant dense<0.000000e+00> : vector<128xf32>
    %30 = vector.multi_reduction <add>, %29, %cst_17 [1] : vector<128x128xf32> to vector<128xf32>
    %31 = vector.shape_cast %30 : vector<128xf32> to vector<128x1xf32>
    %32 = arith.addf %26, %31 : vector<128x1xf32>
    %c0_18 = arith.constant 0 : index
    %c0_19 = arith.constant 0 : index
    %33 = vector.load %arg12[%c0_18, %c0_19] : memref<128x1xf32, #tpu.memory_space<vmem>>, vector<128x1xf32>
    tpu.vector_store %arg12[%c0_18, %c0_19], %32 {strides = array<i32>} : memref<128x1xf32, #tpu.memory_space<vmem>>, vector<128x1xf32>,
    %c0_20 = arith.constant 0 : index
    %c0_21 = arith.constant 0 : index
    %34 = vector.load %arg13[%c0_20, %c0_21] : memref<128x1xf32, #tpu.memory_space<vmem>>, vector<128x1xf32>
    %cst_22 = arith.constant 0.000000e+00 : f32
    %35 = vector.broadcast %cst_22 : f32 to vector<128x128xf32>
    %36 = arith.select %10, %15, %35 : vector<128x128xi1>, vector<128x128xf32>
    %cst_23 = arith.constant dense<0.000000e+00> : vector<128xf32>
    %37 = vector.multi_reduction <add>, %36, %cst_23 [1] : vector<128x128xf32> to vector<128xf32>
    %38 = vector.shape_cast %37 : vector<128xf32> to vector<128x1xf32>
    %39 = arith.addf %34, %38 : vector<128x1xf32>
    %c0_24 = arith.constant 0 : index
    %c0_25 = arith.constant 0 : index
    %40 = vector.load %arg13[%c0_24, %c0_25] : memref<128x1xf32, #tpu.memory_space<vmem>>, vector<128x1xf32>
    tpu.vector_store %arg13[%c0_24, %c0_25], %39 {strides = array<i32>} : memref<128x1xf32, #tpu.memory_space<vmem>>, vector<128x1xf32>,
    %c0_26 = arith.constant 0 : index
    %c0_27 = arith.constant 0 : index
    %41 = vector.load %arg11[%c0_26, %c0_27] : memref<128x1xf32, #tpu.memory_space<vmem>>, vector<128x1xf32>
    tpu.vector_store %arg11[%c0_26, %c0_27], %21 {strides = array<i32>} : memref<128x1xf32, #tpu.memory_space<vmem>>, vector<128x1xf32>,
    %c0_28 = arith.constant 0 : index
    %c0_29 = arith.constant 0 : index
    %42 = vector.load %arg4[%c0_28, %c0_29] : memref<128x32xbf16, #tpu.memory_space<vmem>>, vector<128x32xbf16>
    %c0_30 = arith.constant 0 : index
    %c0_31 = arith.constant 0 : index
    %43 = vector.load %arg6[%c0_30, %c0_31] : memref<32x128xbf16, #tpu.memory_space<vmem>>, vector<32x128xbf16>
    %cst_32 = arith.constant dense<0.000000e+00> : vector<128x128xf32>
    %44 = tpu.matmul %42, %43, %cst_32 {dimension_numbers = #tpu.dot_dimension_numbers<[1], [0], [0], [1], [0, 0, 1, 1], [], []>} : vector<128x32xbf16>, vector<32x128xbf16>, vector<128x128xf32> -> vector<128x128xf32>
    %c0_33 = arith.constant 0 : index
    %45 = memref.load %arg2[%c0_33] : memref<1xf32, #tpu.memory_space<smem>>
    %46 = vector.broadcast %45 : f32 to vector<128x128xf32>
    %47 = arith.mulf %44, %46 : vector<128x128xf32>
    %48 = vector.broadcast %4 : vector<1x128xf32> to vector<128x128xf32>
    %49 = arith.addf %47, %48 : vector<128x128xf32>
    %c0_34 = arith.constant 0 : index
    %c0_35 = arith.constant 0 : index
    %50 = vector.load %arg14[%c0_34, %c0_35] : memref<128x1xf32, #tpu.memory_space<vmem>>, vector<128x1xf32>
    %cst_36 = arith.constant dense<0xFF800000> : vector<128xf32>
    %51 = vector.multi_reduction <maximumf>, %49, %cst_36 [1] : vector<128x128xf32> to vector<128xf32>
    %52 = vector.shape_cast %51 : vector<128xf32> to vector<128x1xf32>
    %53 = arith.maximumf %50, %52 : vector<128x1xf32>
    %c0_37 = arith.constant 0 : index
    %c0_38 = arith.constant 0 : index
    %54 = vector.load %arg14[%c0_37, %c0_38] : memref<128x1xf32, #tpu.memory_space<vmem>>, vector<128x1xf32>
    %55 = arith.subf %54, %53 : vector<128x1xf32>
    %56 = math.exp %55 : vector<128x1xf32>
    %c0_39 = arith.constant 0 : index
    %c0_40 = arith.constant 0 : index
    %57 = vector.load %arg15[%c0_39, %c0_40] : memref<128x1xf32, #tpu.memory_space<vmem>>, vector<128x1xf32>
    %58 = arith.mulf %56, %57 : vector<128x1xf32>
    %59 = vector.broadcast %53 : vector<128x1xf32> to vector<128x128xf32>
    %60 = arith.subf %49, %59 : vector<128x128xf32>
    %61 = math.exp %60 : vector<128x128xf32>
    %cst_41 = arith.constant dense<0.000000e+00> : vector<128xf32>
    %62 = vector.multi_reduction <add>, %61, %cst_41 [1] : vector<128x128xf32> to vector<128xf32>
    %63 = vector.shape_cast %62 : vector<128xf32> to vector<128x1xf32>
    %64 = arith.addf %58, %63 : vector<128x1xf32>
    %c0_42 = arith.constant 0 : index
    %c0_43 = arith.constant 0 : index
    %65 = vector.load %arg15[%c0_42, %c0_43] : memref<128x1xf32, #tpu.memory_space<vmem>>, vector<128x1xf32>
    tpu.vector_store %arg15[%c0_42, %c0_43], %64 {strides = array<i32>} : memref<128x1xf32, #tpu.memory_space<vmem>>, vector<128x1xf32>,
    %c0_44 = arith.constant 0 : index
    %c0_45 = arith.constant 0 : index
    %66 = vector.load %arg16[%c0_44, %c0_45] : memref<128x1xf32, #tpu.memory_space<vmem>>, vector<128x1xf32>
    %cst_46 = arith.constant 0.000000e+00 : f32
    %67 = vector.broadcast %cst_46 : f32 to vector<128x128xf32>
    %68 = arith.select %10, %49, %67 : vector<128x128xi1>, vector<128x128xf32>
    %cst_47 = arith.constant dense<0.000000e+00> : vector<128xf32>
    %69 = vector.multi_reduction <add>, %68, %cst_47 [1] : vector<128x128xf32> to vector<128xf32>
    %70 = vector.shape_cast %69 : vector<128xf32> to vector<128x1xf32>
    %71 = arith.addf %66, %70 : vector<128x1xf32>
    %c0_48 = arith.constant 0 : index
    %c0_49 = arith.constant 0 : index
    %72 = vector.load %arg16[%c0_48, %c0_49] : memref<128x1xf32, #tpu.memory_space<vmem>>, vector<128x1xf32>
    tpu.vector_store %arg16[%c0_48, %c0_49], %71 {strides = array<i32>} : memref<128x1xf32, #tpu.memory_space<vmem>>, vector<128x1xf32>,
    %c0_50 = arith.constant 0 : index
    %c0_51 = arith.constant 0 : index
    %73 = vector.load %arg14[%c0_50, %c0_51] : memref<128x1xf32, #tpu.memory_space<vmem>>, vector<128x1xf32>
    tpu.vector_store %arg14[%c0_50, %c0_51], %53 {strides = array<i32>} : memref<128x1xf32, #tpu.memory_space<vmem>>, vector<128x1xf32>,
    %c0_i32_52 = arith.constant 0 : i32
    %74 = arith.cmpi eq, %arg1, %c0_i32_52 : i32
    %75 = arith.extui %74 : i1 to i32
    %c0_i32_53 = arith.constant 0 : i32
    %76 = arith.cmpi ne, %75, %c0_i32_53 : i32
    scf.if %76 {
      %c0_54 = arith.constant 0 : index
      %c0_55 = arith.constant 0 : index
      %77 = vector.load %arg11[%c0_54, %c0_55] : memref<128x1xf32, #tpu.memory_space<vmem>>, vector<128x1xf32>
      %c0_56 = arith.constant 0 : index
      %c0_57 = arith.constant 0 : index
      %78 = vector.load %arg12[%c0_56, %c0_57] : memref<128x1xf32, #tpu.memory_space<vmem>>, vector<128x1xf32>
      %79 = math.log %78 : vector<128x1xf32>
      %80 = arith.addf %77, %79 : vector<128x1xf32>
      %c0_58 = arith.constant 0 : index
      %c0_59 = arith.constant 0 : index
      %81 = vector.load %arg13[%c0_58, %c0_59] : memref<128x1xf32, #tpu.memory_space<vmem>>, vector<128x1xf32>
      %82 = arith.subf %80, %81 : vector<128x1xf32>
      %c0_60 = arith.constant 0 : index
      %c0_61 = arith.constant 0 : index
      %83 = vector.load %arg14[%c0_60, %c0_61] : memref<128x1xf32, #tpu.memory_space<vmem>>, vector<128x1xf32>
      %c0_62 = arith.constant 0 : index
      %c0_63 = arith.constant 0 : index
      %84 = vector.load %arg15[%c0_62, %c0_63] : memref<128x1xf32, #tpu.memory_space<vmem>>, vector<128x1xf32>
      %85 = math.log %84 : vector<128x1xf32>
      %86 = arith.addf %83, %85 : vector<128x1xf32>
      %c0_64 = arith.constant 0 : index
      %c0_65 = arith.constant 0 : index
      %87 = vector.load %arg16[%c0_64, %c0_65] : memref<128x1xf32, #tpu.memory_space<vmem>>, vector<128x1xf32>
      %88 = arith.subf %86, %87 : vector<128x1xf32>
      %cst_66 = arith.constant 8.000000e-01 : f32
      %89 = vector.broadcast %cst_66 : f32 to vector<128x1xf32>
      %90 = arith.mulf %89, %82 : vector<128x1xf32>
      %cst_67 = arith.constant 2.000000e-01 : f32
      %91 = vector.broadcast %cst_67 : f32 to vector<128x1xf32>
      %92 = arith.mulf %91, %88 : vector<128x1xf32>
      %93 = arith.addf %90, %92 : vector<128x1xf32>
      %c0_i32_68 = arith.constant 0 : i32
      %94 = vector.broadcast %c0_i32_68 : i32 to vector<128x1xi32>
      %95 = arith.cmpi sge, %3, %94 : vector<128x1xi32>
      %cst_69 = arith.constant 0.000000e+00 : f32
      %96 = vector.broadcast %cst_69 : f32 to vector<128x1xf32>
      %97 = arith.select %95, %93, %96 : vector<128x1xi1>, vector<128x1xf32>
      %c0_70 = arith.constant 0 : index
      %c0_71 = arith.constant 0 : index
      %98 = vector.load %arg10[%c0_70, %c0_71] : memref<128x1xf32, #tpu.memory_space<vmem>>, vector<128x1xf32>
      tpu.vector_store %arg10[%c0_70, %c0_71], %97 {strides = array<i32>} : memref<128x1xf32, #tpu.memory_space<vmem>>, vector<128x1xf32>,
    } else {
    }
    return
  }
  func.func @transform_0(%arg0: i32, %arg1: i32) -> i32 {
    %c0_i32 = arith.constant 0 : i32
    %c0_i32_0 = arith.constant 0 : i32
    return %c0_i32 : i32
  }
  func.func @transform_1(%arg0: i32, %arg1: i32) -> (i32, i32) {
    %c0_i32 = arith.constant 0 : i32
    %c0_i32_0 = arith.constant 0 : i32
    return %arg0, %c0_i32 : i32, i32
  }
  func.func @transform_2(%arg0: i32, %arg1: i32) -> (i32, i32) {
    %c0_i32 = arith.constant 0 : i32
    %c0_i32_0 = arith.constant 0 : i32
    return %arg0, %c0_i32 : i32, i32
  }
  func.func @transform_3(%arg0: i32, %arg1: i32) -> (i32, i32) {
    %c0_i32 = arith.constant 0 : i32
    %c0_i32_0 = arith.constant 0 : i32
    return %c0_i32, %arg1 : i32, i32
  }
  func.func @transform_4(%arg0: i32, %arg1: i32) -> (i32, i32) {
    %c0_i32 = arith.constant 0 : i32
    %c0_i32_0 = arith.constant 0 : i32
    return %c0_i32, %arg1 : i32, i32
  }
  func.func @transform_5(%arg0: i32, %arg1: i32) -> (i32, i32) {
    %c0_i32 = arith.constant 0 : i32
    %c0_i32_0 = arith.constant 0 : i32
    return %c0_i32, %arg1 : i32, i32
  }
  func.func @transform_6(%arg0: i32, %arg1: i32) -> (i32, i32) {
    %c0_i32 = arith.constant 0 : i32
    %c0_i32_0 = arith.constant 0 : i32
    return %arg0, %c0_i32 : i32, i32
  }
  func.func @transform_7(%arg0: i32, %arg1: i32) -> (i32, i32) {
    %c0_i32 = arith.constant 0 : i32
    return %arg0, %arg1 : i32, i32
  }
  func.func @transform_8(%arg0: i32, %arg1: i32) -> (i32, i32) {
    %c0_i32 = arith.constant 0 : i32
    %c0_i32_0 = arith.constant 0 : i32
    return %arg0, %c0_i32 : i32, i32
  }
}

</mosaic_0001>

<bundles_post_ra>
// kernel: mixed_qat_forward.1
= control target key start
LH: loop header
LB: loop body
LE: loop exit
PB: predicated region body
PF: predicated region fallthrough
CT: control target
= control target key end

     0   :  { %v2377_v1 = vmov 0   ;;  %vm311_vm0 = vcmask 261120   ;;  %vm34_vm1 = vcmask 7168   ;;  %v2378_v37 = vmov -1e+30   ;;  %s3858_s3 = inlined_call_operand.vmem [shape: bf16[32,128], index: 3, kind: input, shape index: {}]   ;;  %s3859_s4 = inlined_call_operand.vmem [shape: bf16[32,128], index: 4, kind: input, shape index: {}]   ;;  %s3860_s1 = inlined_call_operand.vmem [shape: bf16[128,32], index: 1, kind: input, shape index: {}]   ;;  %s3861_s2 = inlined_call_operand.vmem [shape: bf16[128,32], index: 2, kind: input, shape index: {}]   ;;  %s3862_s6 = inlined_call_operand.vmem [shape: s32[128,1], index: 6, kind: input, shape index: {}]   ;;  %s3863_s5 = inlined_call_operand.vmem [shape: f32[1,128], index: 5, kind: input, shape index: {}]   ;;  %s3864_s0 = inlined_call_operand.<no memory space> [shape: f32[1], index: 0, kind: input, shape index: {}]   ;;  %s3865_s7 = inlined_call_operand.vmem [shape: bf16[128,128], index: 7, kind: output, shape index: {0}]   ;;  %s3866_s8 = inlined_call_operand.vmem [shape: f32[128,1], index: 8, kind: output, shape index: {1}]  }
   0x1   :  { %v2149_v0 = vld [vmem:[%s3858_s3 + $0x8] sm:$0xff]   ;;  %2148 = vset.pattern.permute.xlu1 %v2377_v1  ;;  %2147 = vset.pattern.permute.xlu0 %v2377_v1  ;;  %v2151_v3 = vld [vmem:[%s3858_s3] sm:$0xff]   ;;  %v2157_v9 = vld [vmem:[%s3860_s1 + $0x10] sm:$0xff]   ;;  %37 = vst.msk [vmem:[#allocation2 + $0x10] sm:$0xff] %vm34_vm1, %v2378_v37  ;;  %v164_v38 = vlaneseq  ;;  %v2598_v45 = vstv %s3864_s0  ;;  %v3867_v61 = vmov 0.0  }
   0x2   :  { %v2150_v2 = vld [vmem:[%s3859_s4 + $0x8] sm:$0xff]   ;;  %2104 = vmatprep.subr.bf16.mxu0 %v2149_v0  ;;  %v2152_v4 = vld [vmem:[%s3859_s4] sm:$0xff]   ;;  %v2158_v10 = vld [vmem:[%s3861_s2 + $0x10] sm:$0xff]   ;;  %35 = vst.msk [vmem:[#allocation2] sm:$0xff] %vm34_vm1, %v2378_v37 }
   0x3   :  { %2124 = vmatprep.subr.bf16.mxu1 %v2150_v2  ;;  %2105 = vmatpush3.bf16.msra.mxu0 %v2149_v0  ;;  %v2153_v5 = vld [vmem:[%s3860_s1] sm:$0xff]   ;;  %v2155_v7 = vld [vmem:[%s3860_s1 + $0x8] sm:$0xff]   ;;  %v2159_v11 = vld [vmem:[%s3860_s1 + $0x18] sm:$0xff]   ;;  %36 = vst.msk [vmem:[#allocation2 + $0x8] sm:$0xff] %vm34_vm1, %v2378_v37  ;;  %v2581_v39 = vand.u32 127, %v164_v38 }
   0x4   :  { %2125 = vmatpush3.bf16.msra.mxu1 %v2150_v2  ;;  %2106 = vmatprep.subr.bf16.mxu0 %v2151_v3  ;;  %v2154_v6 = vld [vmem:[%s3861_s2] sm:$0xff]   ;;  %v2156_v8 = vld [vmem:[%s3861_s2 + $0x8] sm:$0xff]   ;;  %v2160_v12 = vld [vmem:[%s3861_s2 + $0x18] sm:$0xff]   ;;  %38 = vst.msk [vmem:[#allocation2 + $0x18] sm:$0xff] %vm34_vm1, %v2378_v37 }
   0x5   :  { %2126 = vmatprep.subr.bf16.mxu1 %v2152_v4  ;;  %2108 = vmatprep.mubr.msk.bf16.mxu0 %vm311_vm0, %v2153_v5  ;;  %v2161_v13 = vld [vmem:[%s3860_s1 + $0x20] sm:$0xff]   ;;  %v149_v15 = vld [vmem:[%s3862_s6 + $0x10] sm:$0xff]  ;;  %v2163_v17 = vld [vmem:[%s3860_s1 + $0x28] sm:$0xff]   ;;  %39 = vst.msk [vmem:[#allocation2 + $0x20] sm:$0xff] %vm34_vm1, %v2378_v37 }
   0x6   :  { %2128 = vmatprep.mubr.msk.bf16.mxu1 %vm311_vm0, %v2154_v6  ;;  %v2162_v14 = vld [vmem:[%s3861_s2 + $0x20] sm:$0xff]   ;;  %176 = vperm.xlu1 %2148, %v149_v15   ;;  %v150_v18 = vld [vmem:[%s3862_s6 + $0x18] sm:$0xff]  ;;  %v148_v19 = vld [vmem:[%s3862_s6 + $0x8] sm:$0xff]  ;;  %40 = vst.msk [vmem:[#allocation2 + $0x28] sm:$0xff] %vm34_vm1, %v2378_v37 }
   0x7   :  { %2107 = vmatpush3.bf16.msra.mxu0 %v2151_v3  ;;  %v147_v16 = vld [vmem:[%s3862_s6] sm:$0xff]  ;;  %v2164_v20 = vld [vmem:[%s3861_s2 + $0x28] sm:$0xff]   ;;  %v2165_v21 = vld [vmem:[%s3860_s1 + $0x30] sm:$0xff]   ;;  %41 = vst.msk [vmem:[#allocation2 + $0x30] sm:$0xff] %vm34_vm1, %v2378_v37 }
   0x8   :  { %2127 = vmatpush3.bf16.msra.mxu1 %v2152_v4  ;;  %170 = vperm.xlu0 %2147, %v147_v16   ;;  %v2166_v22 = vld [vmem:[%s3861_s2 + $0x30] sm:$0xff]   ;;  %v152_v23 = vld [vmem:[%s3862_s6 + $0x28] sm:$0xff]  ;;  %v151_v24 = vld [vmem:[%s3862_s6 + $0x20] sm:$0xff]  ;;  %42 = vst.msk [vmem:[#allocation2 + $0x38] sm:$0xff] %vm34_vm1, %v2378_v37 }
   0x9   :  { %v2167_v25 = vld [vmem:[%s3860_s1 + $0x38] sm:$0xff]   ;;  %v153_v27 = vld [vmem:[%s3862_s6 + $0x30] sm:$0xff]  ;;  %v156_v29 = vld [vmem:[%s3862_s6 + $0x48] sm:$0xff]  ;;  %43 = vst.msk [vmem:[#allocation2 + $0x40] sm:$0xff] %vm34_vm1, %v2378_v37 }
   0xa   :  { %2109 = vmatmul.mubr.msk.bf16.vlgmr.msra.gmra.mxu0 %vm311_vm0, %v2155_v7  ;;  %179 = vperm.xlu1 %2148, %v150_v18   ;;  %v154_v26 = vld [vmem:[%s3862_s6 + $0x38] sm:$0xff]  ;;  %v155_v30 = vld [vmem:[%s3862_s6 + $0x40] sm:$0xff]  ;;  %v157_v32 = vld [vmem:[%s3862_s6 + $0x50] sm:$0xff]  ;;  %44 = vst.msk [vmem:[#allocation2 + $0x48] sm:$0xff] %vm34_vm1, %v2378_v37 }
   0xb   :  { %2129 = vmatmul.mubr.msk.bf16.vlgmr.msra.gmra.mxu1 %vm311_vm0, %v2156_v8  ;;  %2112 = vmatprep.mubr.msk.bf16.mxu0 %vm311_vm0, %v2157_v9  ;;  %v2168_v28 = vld [vmem:[%s3861_s2 + $0x38] sm:$0xff]   ;;  %v160_v33 = vld [vmem:[%s3862_s6 + $0x68] sm:$0xff]  ;;  %v159_v34 = vld [vmem:[%s3862_s6 + $0x60] sm:$0xff]  ;;  %45 = vst.msk [vmem:[#allocation2 + $0x50] sm:$0xff] %vm34_vm1, %v2378_v37 }
   0xc   :  { %2132 = vmatprep.mubr.msk.bf16.mxu1 %vm311_vm0, %v2158_v10  ;;  %173 = vperm.xlu0 %2147, %v148_v19   ;;  %v158_v31 = vld [vmem:[%s3862_s6 + $0x58] sm:$0xff]  ;;  %v161_v36 = vld [vmem:[%s3862_s6 + $0x70] sm:$0xff]  ;;  %46 = vst.msk [vmem:[#allocation2 + $0x58] sm:$0xff] %vm34_vm1, %v2378_v37  ;;  %47 = vst.msk [vmem:[#allocation2 + $0x60] sm:$0xff] %vm34_vm1, %v2378_v37 }
   0xd   :  { %v162_v35 = vld [vmem:[%s3862_s6 + $0x78] sm:$0xff]  ;;  %48 = vst.msk [vmem:[#allocation2 + $0x68] sm:$0xff] %vm34_vm1, %v2378_v37  ;;  %49 = vst.msk [vmem:[#allocation2 + $0x70] sm:$0xff] %vm34_vm1, %v2378_v37  ;;  %v2586_v40 = vld [vmem:[%s3863_s5] ss:$0 sm:$0xff] }
   0xe   :  { %185 = vperm.xlu1 %2148, %v152_v23   ;;  %50 = vst.msk [vmem:[#allocation2 + $0x78] sm:$0xff] %vm34_vm1, %v2378_v37  ;;  %83 = vst.msk [vmem:[#allocation5] sm:$0xff] %vm34_vm1, %v2378_v37 }
   0xf   :  { %84 = vst.msk [vmem:[#allocation5 + $0x8] sm:$0xff] %vm34_vm1, %v2378_v37  ;;  %85 = vst.msk [vmem:[#allocation5 + $0x10] sm:$0xff] %vm34_vm1, %v2378_v37 }
  0x10   :  { %182 = vperm.xlu0 %2147, %v151_v24   ;;  %86 = vst.msk [vmem:[#allocation5 + $0x18] sm:$0xff] %vm34_vm1, %v2378_v37  ;;  %87 = vst.msk [vmem:[#allocation5 + $0x20] sm:$0xff] %vm34_vm1, %v2378_v37 }
  0x11   :  { %88 = vst.msk [vmem:[#allocation5 + $0x28] sm:$0xff] %vm34_vm1, %v2378_v37  ;;  %89 = vst.msk [vmem:[#allocation5 + $0x30] sm:$0xff] %vm34_vm1, %v2378_v37 }
  0x12   :  { %2113 = vmatmul.mubr.msk.bf16.gmra.mxu0 %vm311_vm0, %v2159_v11  ;;  %191 = vperm.xlu1 %2148, %v154_v26   ;;  %90 = vst.msk [vmem:[#allocation5 + $0x38] sm:$0xff] %vm34_vm1, %v2378_v37  ;;  %91 = vst.msk [vmem:[#allocation5 + $0x40] sm:$0xff] %vm34_vm1, %v2378_v37 }
  0x13   :  { %2133 = vmatmul.mubr.msk.bf16.gmra.mxu1 %vm311_vm0, %v2160_v12  ;;  %2116 = vmatprep.mubr.msk.bf16.mxu0 %vm311_vm0, %v2161_v13  ;;  %92 = vst.msk [vmem:[#allocation5 + $0x48] sm:$0xff] %vm34_vm1, %v2378_v37  ;;  %93 = vst.msk [vmem:[#allocation5 + $0x50] sm:$0xff] %vm34_vm1, %v2378_v37 }
  0x14   :  { %2136 = vmatprep.mubr.msk.bf16.mxu1 %vm311_vm0, %v2162_v14  ;;  %188 = vperm.xlu0 %2147, %v153_v27   ;;  %94 = vst.msk [vmem:[#allocation5 + $0x58] sm:$0xff] %vm34_vm1, %v2378_v37  ;;  %95 = vst.msk [vmem:[#allocation5 + $0x60] sm:$0xff] %vm34_vm1, %v2378_v37 }
  0x15   :  { %96 = vst.msk [vmem:[#allocation5 + $0x68] sm:$0xff] %vm34_vm1, %v2378_v37  ;;  %97 = vst.msk [vmem:[#allocation5 + $0x70] sm:$0xff] %vm34_vm1, %v2378_v37 }
  0x16   :  { %197 = vperm.xlu1 %2148, %v156_v29   ;;  %98 = vst.msk [vmem:[#allocation5 + $0x78] sm:$0xff] %vm34_vm1, %v2378_v37  ;;  %69 = vst.msk [vmem:[#allocation4 + $0x10] sm:$0xff] %vm34_vm1, %v3867_v61 }
  0x17   :  { %51 = vst.msk [vmem:[#allocation3] sm:$0xff] %vm34_vm1, %v3867_v61  ;;  %52 = vst.msk [vmem:[#allocation3 + $0x8] sm:$0xff] %vm34_vm1, %v3867_v61 }
  0x18   :  { %194 = vperm.xlu0 %2147, %v155_v30   ;;  %53 = vst.msk [vmem:[#allocation3 + $0x10] sm:$0xff] %vm34_vm1, %v3867_v61  ;;  %54 = vst.msk [vmem:[#allocation3 + $0x18] sm:$0xff] %vm34_vm1, %v3867_v61 }
  0x19   :  { %55 = vst.msk [vmem:[#allocation3 + $0x20] sm:$0xff] %vm34_vm1, %v3867_v61  ;;  %56 = vst.msk [vmem:[#allocation3 + $0x28] sm:$0xff] %vm34_vm1, %v3867_v61 }
  0x1a   :  { %2117 = vmatmul.mubr.msk.bf16.gmra.mxu0 %vm311_vm0, %v2163_v17  ;;  %203 = vperm.xlu1 %2148, %v158_v31   ;;  %57 = vst.msk [vmem:[#allocation3 + $0x30] sm:$0xff] %vm34_vm1, %v3867_v61  ;;  %58 = vst.msk [vmem:[#allocation3 + $0x38] sm:$0xff] %vm34_vm1, %v3867_v61 }
  0x1b   :  { %2137 = vmatmul.mubr.msk.bf16.gmra.mxu1 %vm311_vm0, %v2164_v20  ;;  %2120 = vmatprep.mubr.msk.bf16.mxu0 %vm311_vm0, %v2165_v21  ;;  %59 = vst.msk [vmem:[#allocation3 + $0x40] sm:$0xff] %vm34_vm1, %v3867_v61  ;;  %60 = vst.msk [vmem:[#allocation3 + $0x48] sm:$0xff] %vm34_vm1, %v3867_v61 }
  0x1c   :  { %2140 = vmatprep.mubr.msk.bf16.mxu1 %vm311_vm0, %v2166_v22  ;;  %200 = vperm.xlu0 %2147, %v157_v32   ;;  %61 = vst.msk [vmem:[#allocation3 + $0x50] sm:$0xff] %vm34_vm1, %v3867_v61  ;;  %62 = vst.msk [vmem:[#allocation3 + $0x58] sm:$0xff] %vm34_vm1, %v3867_v61 }
  0x1d   :  { %63 = vst.msk [vmem:[#allocation3 + $0x60] sm:$0xff] %vm34_vm1, %v3867_v61  ;;  %64 = vst.msk [vmem:[#allocation3 + $0x68] sm:$0xff] %vm34_vm1, %v3867_v61 }
  0x1e   :  { %209 = vperm.xlu1 %2148, %v160_v33   ;;  %65 = vst.msk [vmem:[#allocation3 + $0x70] sm:$0xff] %vm34_vm1, %v3867_v61  ;;  %66 = vst.msk [vmem:[#allocation3 + $0x78] sm:$0xff] %vm34_vm1, %v3867_v61 }
  0x1f   :  { %67 = vst.msk [vmem:[#allocation4] sm:$0xff] %vm34_vm1, %v3867_v61  ;;  %68 = vst.msk [vmem:[#allocation4 + $0x8] sm:$0xff] %vm34_vm1, %v3867_v61 }
  0x20   :  { %206 = vperm.xlu0 %2147, %v159_v34   ;;  %70 = vst.msk [vmem:[#allocation4 + $0x18] sm:$0xff] %vm34_vm1, %v3867_v61  ;;  %71 = vst.msk [vmem:[#allocation4 + $0x20] sm:$0xff] %vm34_vm1, %v3867_v61 }
  0x21   :  { %72 = vst.msk [vmem:[#allocation4 + $0x28] sm:$0xff] %vm34_vm1, %v3867_v61  ;;  %73 = vst.msk [vmem:[#allocation4 + $0x30] sm:$0xff] %vm34_vm1, %v3867_v61 }
  0x22   :  { %2121 = vmatmul.mubr.msk.bf16.gmra.mxu0 %vm311_vm0, %v2167_v25  ;;  %215 = vperm.xlu1 %2148, %v162_v35   ;;  %74 = vst.msk [vmem:[#allocation4 + $0x38] sm:$0xff] %vm34_vm1, %v3867_v61  ;;  %75 = vst.msk [vmem:[#allocation4 + $0x40] sm:$0xff] %vm34_vm1, %v3867_v61 }
  0x23   :  { %2141 = vmatmul.mubr.msk.bf16.gmra.mxu1 %vm311_vm0, %v2168_v28  ;;  %76 = vst.msk [vmem:[#allocation4 + $0x48] sm:$0xff] %vm34_vm1, %v3867_v61  ;;  %77 = vst.msk [vmem:[#allocation4 + $0x50] sm:$0xff] %vm34_vm1, %v3867_v61 }
  0x24   :  { %212 = vperm.xlu0 %2147, %v161_v36   ;;  %78 = vst.msk [vmem:[#allocation4 + $0x58] sm:$0xff] %vm34_vm1, %v3867_v61  ;;  %79 = vst.msk [vmem:[#allocation4 + $0x60] sm:$0xff] %vm34_vm1, %v3867_v61 }
  0x25   :  { %80 = vst.msk [vmem:[#allocation4 + $0x68] sm:$0xff] %vm34_vm1, %v3867_v61  ;;  %81 = vst.msk [vmem:[#allocation4 + $0x70] sm:$0xff] %vm34_vm1, %v3867_v61 }
  0x26   :  { %82 = vst.msk [vmem:[#allocation4 + $0x78] sm:$0xff] %vm34_vm1, %v3867_v61  ;;  %99 = vst.msk [vmem:[#allocation6] sm:$0xff] %vm34_vm1, %v3867_v61 }
  0x27   :  { %100 = vst.msk [vmem:[#allocation6 + $0x8] sm:$0xff] %vm34_vm1, %v3867_v61  ;;  %101 = vst.msk [vmem:[#allocation6 + $0x10] sm:$0xff] %vm34_vm1, %v3867_v61 }
  0x28   :  { %102 = vst.msk [vmem:[#allocation6 + $0x18] sm:$0xff] %vm34_vm1, %v3867_v61  ;;  %103 = vst.msk [vmem:[#allocation6 + $0x20] sm:$0xff] %vm34_vm1, %v3867_v61 }
  0x29   :  { %104 = vst.msk [vmem:[#allocation6 + $0x28] sm:$0xff] %vm34_vm1, %v3867_v61  ;;  %105 = vst.msk [vmem:[#allocation6 + $0x30] sm:$0xff] %vm34_vm1, %v3867_v61 }
  0x2a   :  { %106 = vst.msk [vmem:[#allocation6 + $0x38] sm:$0xff] %vm34_vm1, %v3867_v61  ;;  %107 = vst.msk [vmem:[#allocation6 + $0x40] sm:$0xff] %vm34_vm1, %v3867_v61 }
  0x2b   :  { %108 = vst.msk [vmem:[#allocation6 + $0x48] sm:$0xff] %vm34_vm1, %v3867_v61  ;;  %109 = vst.msk [vmem:[#allocation6 + $0x50] sm:$0xff] %vm34_vm1, %v3867_v61 }
  0x2c   :  { %110 = vst.msk [vmem:[#allocation6 + $0x58] sm:$0xff] %vm34_vm1, %v3867_v61  ;;  %111 = vst.msk [vmem:[#allocation6 + $0x60] sm:$0xff] %vm34_vm1, %v3867_v61 }
  0x2d   :  { %112 = vst.msk [vmem:[#allocation6 + $0x68] sm:$0xff] %vm34_vm1, %v3867_v61  ;;  %113 = vst.msk [vmem:[#allocation6 + $0x70] sm:$0xff] %vm34_vm1, %v3867_v61 }
  0x2e   :  { %114 = vst.msk [vmem:[#allocation6 + $0x78] sm:$0xff] %vm34_vm1, %v3867_v61  ;;  %115 = vst.msk [vmem:[#allocation7] sm:$0xff] %vm34_vm1, %v3867_v61 }
  0x2f   :  { %116 = vst.msk [vmem:[#allocation7 + $0x8] sm:$0xff] %vm34_vm1, %v3867_v61  ;;  %117 = vst.msk [vmem:[#allocation7 + $0x10] sm:$0xff] %vm34_vm1, %v3867_v61 }
  0x30   :  { %118 = vst.msk [vmem:[#allocation7 + $0x18] sm:$0xff] %vm34_vm1, %v3867_v61  ;;  %119 = vst.msk [vmem:[#allocation7 + $0x20] sm:$0xff] %vm34_vm1, %v3867_v61 }
  0x31   :  { %120 = vst.msk [vmem:[#allocation7 + $0x28] sm:$0xff] %vm34_vm1, %v3867_v61  ;;  %121 = vst.msk [vmem:[#allocation7 + $0x30] sm:$0xff] %vm34_vm1, %v3867_v61 }
  0x32   :  { %122 = vst.msk [vmem:[#allocation7 + $0x38] sm:$0xff] %vm34_vm1, %v3867_v61  ;;  %123 = vst.msk [vmem:[#allocation7 + $0x40] sm:$0xff] %vm34_vm1, %v3867_v61 }
  0x33   :  { %124 = vst.msk [vmem:[#allocation7 + $0x48] sm:$0xff] %vm34_vm1, %v3867_v61  ;;  %125 = vst.msk [vmem:[#allocation7 + $0x50] sm:$0xff] %vm34_vm1, %v3867_v61 }
  0x34   :  { %126 = vst.msk [vmem:[#allocation7 + $0x58] sm:$0xff] %vm34_vm1, %v3867_v61  ;;  %127 = vst.msk [vmem:[#allocation7 + $0x60] sm:$0xff] %vm34_vm1, %v3867_v61 }
  0x35   :  { %128 = vst.msk [vmem:[#allocation7 + $0x68] sm:$0xff] %vm34_vm1, %v3867_v61  ;;  %129 = vst.msk [vmem:[#allocation7 + $0x70] sm:$0xff] %vm34_vm1, %v3867_v61 }
  0x36   :  { %130 = vst.msk [vmem:[#allocation7 + $0x78] sm:$0xff] %vm34_vm1, %v3867_v61 }
  0x81   :  { %v2588_v41 = vpop.permute.xlu1 %176 }
  0x82   :  { %vm219_vm2 = vcmp.eq.s32.totalorder %v2581_v39, %v2588_v41 }
  0x83   :  { %v2600_v47 = vpop.permute.xlu0 %170 }
  0x84   :  { %vm217_vm3 = vcmp.eq.s32.totalorder %v2581_v39, %v2600_v47 }
  0x85   :  { %v2814_v15 = vpop.permute.xlu1 %179 }
  0x86   :  { %vm220_vm4 = vcmp.eq.s32.totalorder %v2581_v39, %v2814_v15 }
  0x87   :  { %v174_v17 = vpop.permute.xlu0 %173 }
  0x88   :  { %vm218_vm5 = vcmp.eq.s32.totalorder %v2581_v39, %v174_v17 }
  0x8b   :  { %v2854_v32 = vpop.permute.xlu0 %182 }
  0x8c   :  { %vm221_vm7 = vcmp.eq.s32.totalorder %v2581_v39, %v2854_v32 }
  0xca   :  { %v2110_v42 = vpop.f32.mrf.mxu0 }
  0xcb   :  { %v2593_v43 = vadd.f32 %v2110_v42, %v2586_v40  ;;  %v2130_v44 = vpop.f32.mrf.mxu1 }
  0xcc   :  { %v370_v46 = vpop.f32.mrf.mxu0  ;;  %v2613_v52 = vmul.f32 %v2130_v44, %v2598_v45 }
  0xcd   :  { %v2603_v48 = vadd.f32 %v2586_v40, %v370_v46  ;;  %v1092_v49 = vpop.f32.mrf.mxu1  ;;  %533 = vmax.xlane.f32.xlu0 %v2593_v43  ;;  %v868_v50 = vsel %vm219_vm2, %v2593_v43, 0.0 }
  0xce   :  { %886 = vadd.xlane.f32.xlu1 %v868_v50  ;;  %v2111_v51 = vpop.f32.mrf.mxu0  ;;  %v2621_v55 = vmul.f32 %v2598_v45, %v1092_v49  ;;  %v2768_v63 = vadd.f32 %v2586_v40, %v2613_v52 }
  0xcf   :  { %v2615_v53 = vpop.f32.mrf.mxu1  ;;  %v2618_v54 = vadd.f32 %v2111_v51, %v2586_v40  ;;  %v2635_v60 = vsel %vm217_vm3, %v2603_v48, 0.0 }
  0xd0   :  { %v373_v56 = vpop.f32.mrf.mxu0  ;;  %v2782_v2 = vadd.f32 %v2586_v40, %v2621_v55  ;;  %v1160_v20 = vmul.f32 %v2615_v53, %v2598_v45 }
  0xd1   :  { %v2045_v57 = vpack.c.bf16 %v2618_v54, %v2593_v43  ;;  %v2626_v58 = vadd.f32 %v2586_v40, %v373_v56  ;;  %v2628_v59 = vpop.f32.mrf.mxu1  ;;  %529 = vmax.xlane.f32.xlu0 %v2603_v48  ;;  %v869_v22 = vsel %vm220_vm4, %v2618_v54, 0.0  ;;  %v2887_v56 = vpop.permute.xlu0 %188 }
  0xd2   :  { %v2114_v62 = vpop.f32.mrf.mxu0  ;;  %882 = vadd.xlane.f32.xlu1 %v2635_v60  ;;  %v1541_v14 = vsel %vm217_vm3, %v2782_v2, 0.0  ;;  %v1158_v25 = vmul.f32 %v2598_v45, %v2628_v59  ;;  %v2849_v29 = vadd.f32 %v2586_v40, %v1160_v20  ;;  %3925 = vst [vmem:[#allocation9_spill] sm:$0xff] %v2887_v56  ;;  %vm223_vm6 = vcmp.eq.s32.totalorder %v2581_v39, %v2887_v56 }
  0xd3   :  { %2077 = vst [vmem:[%s3865_s7 + $0x8] sm:$0xff] %v2045_v57   ;;  %v2040_v0 = vpack.c.bf16 %v2626_v58, %v2603_v48  ;;  %v2778_v1 = vpop.f32.mrf.mxu1  ;;  %v2792_v6 = vadd.f32 %v2114_v62, %v2586_v40  ;;  %v867_v31 = vsel %vm218_vm5, %v2626_v58, 0.0 }
  0xd4   :  { %v386_v3 = vpop.f32.mrf.mxu0  ;;  %v2867_v42 = vadd.f32 %v2586_v40, %v1158_v25  ;;  %v1163_v57 = vmul.f32 %v2778_v1, %v2598_v45 }
  0xd5   :  { %2041 = vst [vmem:[%s3865_s7] sm:$0xff] %v2040_v0   ;;  %v2787_v4 = vpop.f32.mrf.mxu1  ;;  %1209 = vmax.xlane.f32.xlu0 %v2768_v63  ;;  %v2800_v10 = vadd.f32 %v2586_v40, %v386_v3  ;;  %v872_v17 = vsel %vm223_vm6, %v2792_v6, 0.0 }
  0xd6   :  { %v2115_v5 = vpop.f32.mrf.mxu0  ;;  %1205 = vmax.xlane.f32.xlu1 %v2782_v2  ;;  %v1161_v25 = vmul.f32 %v2598_v45, %v2787_v4 }
  0xd7   :  { %v2795_v7 = vadd.f32 %v2115_v5, %v2586_v40  ;;  %v2797_v8 = vpop.f32.mrf.mxu1 }
  0xd8   :  { %v389_v9 = vpop.f32.mrf.mxu0 }
  0xd9   :  { %v2055_v11 = vpack.c.bf16 %v2795_v7, %v2792_v6  ;;  %v2805_v12 = vadd.f32 %v2586_v40, %v389_v9  ;;  %v2807_v13 = vpop.f32.mrf.mxu1  ;;  %535 = vmax.xlane.f32.xlu0 %v2618_v54  ;;  %v1542_v9 = vsel %vm218_vm5, %v2867_v42, 0.0 }
  0xda   :  { %v2118_v16 = vpop.f32.mrf.mxu0  ;;  %1557 = vadd.xlane.f32.xlu1 %v1541_v14 }
  0xdb   :  { %2079 = vst [vmem:[%s3865_s7 + $0x18] sm:$0xff] %v2055_v11   ;;  %v2050_v18 = vpack.c.bf16 %v2805_v12, %v2800_v10  ;;  %v2821_v19 = vpop.f32.mrf.mxu1  ;;  %v2840_v26 = vadd.f32 %v2118_v16, %v2586_v40 }
  0xdc   :  { %v402_v21 = vpop.f32.mrf.mxu0 }
  0xdd   :  { %2078 = vst [vmem:[%s3865_s7 + $0x10] sm:$0xff] %v2050_v18   ;;  %v2834_v23 = vpop.f32.mrf.mxu1  ;;  %888 = vadd.xlane.f32.xlu0 %v869_v22  ;;  %v2857_v33 = vadd.f32 %v2586_v40, %v402_v21  ;;  %v2923_v21 = vadd.f32 %v2586_v40, %v1163_v57 }
  0xde   :  { %v2119_v24 = vpop.f32.mrf.mxu0  ;;  %531 = vmax.xlane.f32.xlu1 %v2626_v58 }
  0xdf   :  { %v2843_v27 = vadd.f32 %v2119_v24, %v2586_v40  ;;  %v2845_v28 = vpop.f32.mrf.mxu1 }
  0xe0   :  { %v405_v30 = vpop.f32.mrf.mxu0  ;;  %v1168_v57 = vmul.f32 %v2845_v28, %v2598_v45 }
  0xe1   :  { %v2065_v34 = vpack.c.bf16 %v2843_v27, %v2840_v26  ;;  %v2862_v35 = vadd.f32 %v2586_v40, %v405_v30  ;;  %v1127_v36 = vpop.f32.mrf.mxu1  ;;  %884 = vadd.xlane.f32.xlu0 %v867_v31  ;;  %v2940_v30 = vpop.permute.xlu1 %185  ;;  %v1164_v31 = vmul.f32 %v2797_v8, %v2598_v45 }
  0xe2   :  { %v1166_v37 = vmul.f32 %v2598_v45, %v1127_v36  ;;  %v2122_v38 = vpop.f32.mrf.mxu0  ;;  %1211 = vmax.xlane.f32.xlu1 %v2849_v29  ;;  %v2952_v36 = vadd.f32 %v2586_v40, %v1161_v25  ;;  %vm222_vm9 = vcmp.eq.s32.totalorder %v2581_v39, %v2940_v30  ;;  %v850_v30 = vld [vmem:[#allocation4] sm:$0xff] }
  0xe3   :  { %2081 = vst [vmem:[%s3865_s7 + $0x28] sm:$0xff] %v2065_v34   ;;  %v2060_v44 = vpack.c.bf16 %v2862_v35, %v2857_v33  ;;  %v2142_v46 = vpop.f32.mrf.mxu1  ;;  %v2892_v59 = vadd.f32 %v2122_v38, %v2586_v40  ;;  %v870_v34 = vsel %vm221_vm7, %v2800_v10, 0.0  ;;  %v2955_v4 = vadd.f32 %v2586_v40, %v1164_v31 }
  0xe4   :  { %v2875_v47 = vadd.f32 %v2586_v40, %v1166_v37  ;;  %v1171_v49 = vmul.f32 %v2142_v46, %v2598_v45  ;;  %v418_v50 = vpop.f32.mrf.mxu0  ;;  %v1162_v37 = vmul.f32 %v2598_v45, %v2807_v13  ;;  %v1167_v13 = vmul.f32 %v2821_v19, %v2598_v45 }
  0xe5   :  { %2080 = vst [vmem:[%s3865_s7 + $0x20] sm:$0xff] %v2060_v44   ;;  %v1140_v51 = vpop.f32.mrf.mxu1  ;;  %1207 = vmax.xlane.f32.xlu0 %v2867_v42  ;;  %v2907_v1 = vadd.f32 %v2586_v40, %v418_v50  ;;  %v2958_v8 = vpop.permute.xlu1 %191  ;;  %v871_v50 = vsel %vm222_vm9, %v2805_v12, 0.0  ;;  %v1544_v31 = vsel %vm220_vm4, %v2849_v29, 0.0 }
  0xe6   :  { %v2883_v52 = vadd.f32 %v2586_v40, %v1171_v49  ;;  %v1169_v53 = vmul.f32 %v2598_v45, %v1140_v51  ;;  %v2123_v55 = vpop.f32.mrf.mxu0  ;;  %541 = vmax.xlane.f32.xlu1 %v2792_v6  ;;  %vm224_vm8 = vcmp.eq.s32.totalorder %v2581_v39, %v2958_v8  ;;  %v2969_v44 = vpop.permute.xlu0 %194  ;;  %v2973_v46 = vadd.f32 %v2586_v40, %v1162_v37  ;;  %v3083_v37 = vld [vmem:[#allocation2 + $0x10] sm:$0xff] }
  0xe7   :  { %v2895_v60 = vadd.f32 %v2123_v55, %v2586_v40  ;;  %v2143_v62 = vpop.f32.mrf.mxu1  ;;  %v873_v38 = vsel %vm224_vm8, %v2795_v7, 0.0  ;;  %3926 = vst [vmem:[#allocation10_spill] sm:$0xff] %v2969_v44  ;;  %v2994_v19 = vadd.f32 %v2586_v40, %v1167_v13  ;;  %vm225_vm11 = vcmp.eq.s32.totalorder %v2581_v39, %v2969_v44 }
  0xe8   :  { %v2898_v0 = vadd.f32 %v2586_v40, %v1169_v53  ;;  %v1172_v3 = vmul.f32 %v2143_v62, %v2598_v45  ;;  %v421_v5 = vpop.f32.mrf.mxu0  ;;  %v1165_v53 = vmul.f32 %v2598_v45, %v2834_v23  ;;  %v874_v62 = vsel %vm225_vm11, %v2857_v33, 0.0 }
  0xe9   :  { %v2075_v11 = vpack.c.bf16 %v2895_v60, %v2892_v59  ;;  %v2912_v14 = vadd.f32 %v2586_v40, %v421_v5  ;;  %v1143_v16 = vpop.f32.mrf.mxu1  ;;  %1559 = vadd.xlane.f32.xlu0 %v1542_v9  ;;  %v3000_v55 = vpop.permute.xlu1 %197  ;;  %v3015_v23 = vadd.f32 %v2586_v40, %v1168_v57  ;;  %v3088_v57 = vld [vmem:[#allocation2] sm:$0xff] }
  0xea   :  { %v2919_v18 = vadd.f32 %v2586_v40, %v1172_v3  ;;  %v1170_v20 = vmul.f32 %v2598_v45, %v1143_v16  ;;  %894 = vadd.xlane.f32.xlu1 %v872_v17  ;;  %v2977_v49 = vpop.permute.xlu0 %200  ;;  %v3012_v3 = vadd.f32 %v2586_v40, %v1165_v53  ;;  %vm226_vm13 = vcmp.eq.s32.totalorder %v2581_v39, %v3000_v55 }
  0xeb   :  { %2083 = vst [vmem:[%s3865_s7 + $0x38] sm:$0xff] %v2075_v11   ;;  %v2070_v22 = vpack.c.bf16 %v2912_v14, %v2907_v1  ;;  %3927 = vst [vmem:[#allocation11_spill] sm:$0xff] %v2977_v49  ;;  %vm227_vm10 = vcmp.eq.s32.totalorder %v2581_v39, %v2977_v49  ;;  %v875_v9 = vsel %vm226_vm13, %v2862_v35, 0.0 }
  0xec   :  { %v2931_v24 = vadd.f32 %v2586_v40, %v1170_v20  ;;  %v876_v51 = vsel %vm227_vm10, %v2840_v26, 0.0 }
  0xed   :  { %2082 = vst [vmem:[%s3865_s7 + $0x30] sm:$0xff] %v2070_v22   ;;  %1217 = vmax.xlane.f32.xlu0 %v2923_v21  ;;  %v3018_v45 = vpop.permute.xlu1 %203 }
  0xee   :  { %537 = vmax.xlane.f32.xlu1 %v2800_v10  ;;  %v3021_v28 = vpop.permute.xlu0 %206  ;;  %vm228_vm12 = vcmp.eq.s32.totalorder %v2581_v39, %v3018_v45 }
  0xef   :  { %3928 = vst [vmem:[#allocation12_spill] sm:$0xff] %v3021_v28  ;;  %v877_v5 = vsel %vm228_vm12, %v2843_v27, 0.0  ;;  %vm229_vm15 = vcmp.eq.s32.totalorder %v2581_v39, %v3021_v28 }
  0xf0   :  { %v878_v17 = vsel %vm229_vm15, %v2907_v1, 0.0 }
  0xf1   :  { %543 = vmax.xlane.f32.xlu0 %v2795_v7  ;;  %v3047_v16 = vpop.permute.xlu1 %209 }
  0xf2   :  { %890 = vadd.xlane.f32.xlu1 %v870_v34  ;;  %v3030_v40 = vpop.permute.xlu0 %212  ;;  %vm230_vm3 = vcmp.eq.s32.totalorder %v2581_v39, %v3047_v16  ;;  %v1546_v34 = vsel %vm222_vm9, %v2973_v46, 0.0 }
  0xf3   :  { %3929 = vst [vmem:[#allocation13_spill] sm:$0xff] %v3030_v40  ;;  %vm231_vm14 = vcmp.eq.s32.totalorder %v2581_v39, %v3030_v40  ;;  %v879_v25 = vsel %vm230_vm3, %v2912_v14, 0.0 }
  0xf4   :  { %v880_v11 = vsel %vm231_vm14, %v2892_v59, 0.0 }
  0xf5   :  { %1213 = vmax.xlane.f32.xlu0 %v2952_v36  ;;  %v3057_v20 = vpop.permute.xlu1 %215 }
  0xf6   :  { %1219 = vmax.xlane.f32.xlu1 %v2955_v4  ;;  %vm232_vm0 = vcmp.eq.s32.totalorder %v2581_v39, %v3057_v20 }
  0xf7   :  { %v881_v22 = vsel %vm232_vm0, %v2895_v60, 0.0  ;;  %v1556_v45 = vsel %vm232_vm0, %v2919_v18, 0.0 }
  0xf9   :  { %896 = vadd.xlane.f32.xlu0 %v873_v38  ;;  %v852_v38 = vld [vmem:[#allocation4 + $0x10] sm:$0xff] }
  0xfa   :  { %549 = vmax.xlane.f32.xlu1 %v2840_v26 }
  0xfd   :  { %539 = vmax.xlane.f32.xlu0 %v2805_v12 }
  0xfe   :  { %1215 = vmax.xlane.f32.xlu1 %v2973_v46 }
 0x101   :  { %892 = vadd.xlane.f32.xlu0 %v871_v50 }
 0x102   :  { %902 = vadd.xlane.f32.xlu1 %v876_v51 }
 0x105   :  { %1225 = vmax.xlane.f32.xlu0 %v2994_v19 }
 0x106   :  { %545 = vmax.xlane.f32.xlu1 %v2857_v33 }
 0x109   :  { %551 = vmax.xlane.f32.xlu0 %v2843_v27 }
 0x10a   :  { %898 = vadd.xlane.f32.xlu1 %v874_v62 }
 0x10d   :  { %1221 = vmax.xlane.f32.xlu0 %v3012_v3 }
 0x10e   :  { %1227 = vmax.xlane.f32.xlu1 %v3015_v23 }
 0x111   :  { %904 = vadd.xlane.f32.xlu0 %v877_v5 }
 0x112   :  { %557 = vmax.xlane.f32.xlu1 %v2892_v59 }
 0x115   :  { %547 = vmax.xlane.f32.xlu0 %v2862_v35 }
 0x116   :  { %1223 = vmax.xlane.f32.xlu1 %v2875_v47 }
 0x119   :  { %900 = vadd.xlane.f32.xlu0 %v875_v9 }
 0x11a   :  { %910 = vadd.xlane.f32.xlu1 %v880_v11 }
 0x11d   :  { %1233 = vmax.xlane.f32.xlu0 %v2883_v52 }
 0x11e   :  { %553 = vmax.xlane.f32.xlu1 %v2907_v1 }
 0x121   :  { %559 = vmax.xlane.f32.xlu0 %v2895_v60 }
 0x122   :  { %906 = vadd.xlane.f32.xlu1 %v878_v17  ;;  %v3099_v17 = vld [vmem:[#allocation5 + $0x10] sm:$0xff] }
 0x123   :  { %3930 = vst [vmem:[#allocation14_spill] sm:$0xff] %v3099_v17 }
 0x125   :  { %1229 = vmax.xlane.f32.xlu0 %v2898_v0 }
 0x126   :  { %1235 = vmax.xlane.f32.xlu1 %v2919_v18 }
 0x129   :  { %912 = vadd.xlane.f32.xlu0 %v881_v22 }
 0x12a   :  { %1231 = vmax.xlane.f32.xlu1 %v2931_v24 }
 0x12d   :  { %555 = vmax.xlane.f32.xlu0 %v2912_v14 }
 0x131   :  { %908 = vadd.xlane.f32.xlu0 %v879_v25  ;;  %v3106_v25 = vld [vmem:[#allocation5] sm:$0xff] }
 0x132   :  { %3931 = vst [vmem:[#allocation15_spill] sm:$0xff] %v3106_v25 }
 0x135   :  { %1563 = vadd.xlane.f32.xlu0 %v1544_v31 }
 0x139   :  { %1567 = vadd.xlane.f32.xlu0 %v1546_v34 }
 0x156   :  { %v534_v13 = vpop.xlane.xlu0 %533 }
 0x157   :  { %v3086_v50 = vmax.f32 %v3083_v37, %v534_v13  ;;  %v887_v51 = vpop.xlane.xlu1 %886 }
 0x158   :  { %v916_v53 = vadd.f32 %v887_v51, %v852_v38  ;;  %v3115_v51 = vld [vmem:[#allocation2 + $0x18] sm:$0xff] }
 0x159   :  { %948 = vst.msk [vmem:[#allocation2 + $0x10] sm:$0xff] %vm34_vm1, %v3086_v50  ;;  %669 = vperm.xlu1 %2148, %v3086_v50   ;;  %3933 = vst [vmem:[#allocation17_spill] sm:$0xff] %v3115_v51 }
 0x15a   :  { %932 = vst.msk [vmem:[#allocation4 + $0x10] sm:$0xff] %vm34_vm1, %v916_v53  ;;  %v530_v62 = vpop.xlane.xlu0 %529  ;;  %v3132_v53 = vld [vmem:[#allocation2 + $0x8] sm:$0xff] }
 0x15b   :  { %v3097_v5 = vmax.f32 %v3088_v57, %v530_v62  ;;  %v883_v9 = vpop.xlane.xlu1 %882  ;;  %3935 = vst [vmem:[#allocation19_spill] sm:$0xff] %v3132_v53 }
 0x15c   :  { %v914_v11 = vadd.f32 %v883_v9, %v850_v30  ;;  %v1525_v30 = vld [vmem:[#allocation7] sm:$0xff] }
 0x15d   :  { %946 = vst.msk [vmem:[#allocation2] sm:$0xff] %vm34_vm1, %v3097_v5  ;;  %659 = vperm.xlu1 %2148, %v3097_v5  }
 0x15e   :  { %930 = vst.msk [vmem:[#allocation4] sm:$0xff] %vm34_vm1, %v914_v11  ;;  %v1210_v31 = vpop.xlane.xlu0 %1209 }
 0x15f   :  { %v3110_v34 = vmax.f32 %v3099_v17, %v1210_v31  ;;  %v1206_v38 = vpop.xlane.xlu1 %1205  ;;  %v3347_v17 = vld [vmem:[#allocation2 + $0x78] sm:$0xff] }
 0x160   :  { %v3113_v13 = vmax.f32 %v3106_v25, %v1206_v38  ;;  %v853_v38 = vld [vmem:[#allocation4 + $0x18] sm:$0xff]  ;;  %3973 = vst [vmem:[#allocation57_spill] sm:$0xff] %v3347_v17 }
 0x161   :  { %3932 = vst [vmem:[#allocation16_spill] sm:$0xff] %v3110_v34  ;;  %1623 = vst.msk [vmem:[#allocation5 + $0x10] sm:$0xff] %vm34_vm1, %v3110_v34  ;;  %1345 = vperm.xlu1 %2148, %v3110_v34   ;;  %v3335_v34 = vld [vmem:[#allocation5 + $0x70] sm:$0xff] }
 0x162   :  { %1621 = vst.msk [vmem:[#allocation5] sm:$0xff] %vm34_vm1, %v3113_v13  ;;  %v536_v62 = vpop.xlane.xlu0 %535 }
 0x163   :  { %v3125_v9 = vmax.f32 %v3115_v51, %v536_v62  ;;  %v1558_v11 = vpop.xlane.xlu1 %1557  ;;  %v3265_v51 = vld [vmem:[#allocation2 + $0x58] sm:$0xff] }
 0x164   :  { %v1589_v31 = vadd.f32 %v1558_v11, %v1525_v30  ;;  %v851_v30 = vld [vmem:[#allocation4 + $0x8] sm:$0xff]  ;;  %v3139_v11 = vld [vmem:[#allocation5 + $0x18] sm:$0xff]  ;;  %3961 = vst [vmem:[#allocation45_spill] sm:$0xff] %v3265_v51 }
 0x165   :  { %3934 = vst [vmem:[#allocation18_spill] sm:$0xff] %v3125_v9  ;;  %949 = vst.msk [vmem:[#allocation2 + $0x18] sm:$0xff] %vm34_vm1, %v3125_v9  ;;  %674 = vperm.xlu1 %2148, %v3125_v9   ;;  %v3253_v9 = vld [vmem:[#allocation5 + $0x50] sm:$0xff] }
 0x166   :  { %1605 = vst.msk [vmem:[#allocation7] sm:$0xff] %vm34_vm1, %v1589_v31  ;;  %v889_v15 = vpop.xlane.xlu0 %888  ;;  %3937 = vst [vmem:[#allocation21_spill] sm:$0xff] %v3139_v11 }
 0x167   :  { %v917_v61 = vadd.f32 %v889_v15, %v853_v38  ;;  %v532_v25 = vpop.xlane.xlu1 %531  ;;  %3957 = vst [vmem:[#allocation41_spill] sm:$0xff] %v3253_v9 }
 0x168   :  { %v3136_v62 = vmax.f32 %v3132_v53, %v532_v25  ;;  %v3149_v25 = vld [vmem:[#allocation5 + $0x8] sm:$0xff]  ;;  %v3183_v53 = vld [vmem:[#allocation2 + $0x38] sm:$0xff] }
 0x169   :  { %933 = vst.msk [vmem:[#allocation4 + $0x18] sm:$0xff] %vm34_vm1, %v917_v61  ;;  %3938 = vst [vmem:[#allocation22_spill] sm:$0xff] %v3149_v25  ;;  %v3152_v61 = vld [vmem:[#allocation2 + $0x30] sm:$0xff] }
 0x16a   :  { %3936 = vst [vmem:[#allocation20_spill] sm:$0xff] %v3136_v62  ;;  %947 = vst.msk [vmem:[#allocation2 + $0x8] sm:$0xff] %vm34_vm1, %v3136_v62  ;;  %v885_v40 = vpop.xlane.xlu0 %884  ;;  %664 = vperm.xlu0 %2147, %v3136_v62   ;;  %v3171_v62 = vld [vmem:[#allocation5 + $0x30] sm:$0xff] }
 0x16b   :  { %v915_v31 = vadd.f32 %v885_v40, %v851_v30  ;;  %v1212_v15 = vpop.xlane.xlu1 %1211  ;;  %3939 = vst [vmem:[#allocation23_spill] sm:$0xff] %v3152_v61  ;;  %v1526_v30 = vld [vmem:[#allocation7 + $0x8] sm:$0xff]  ;;  %3942 = vst [vmem:[#allocation26_spill] sm:$0xff] %v3171_v62 }
 0x16c   :  { %v3147_v38 = vmax.f32 %v3139_v11, %v1212_v15  ;;  %v3174_v15 = vld [vmem:[#allocation2 + $0x20] sm:$0xff]  ;;  %3946 = vst [vmem:[#allocation30_spill] sm:$0xff] %v3183_v53 }
 0x16d   :  { %931 = vst.msk [vmem:[#allocation4 + $0x8] sm:$0xff] %vm34_vm1, %v915_v31  ;;  %v856_v31 = vld [vmem:[#allocation4 + $0x30] sm:$0xff]  ;;  %3943 = vst [vmem:[#allocation27_spill] sm:$0xff] %v3174_v15 }
 0x16e   :  { %1624 = vst.msk [vmem:[#allocation5 + $0x18] sm:$0xff] %vm34_vm1, %v3147_v38  ;;  %v1208_v22 = vpop.xlane.xlu0 %1207 }
 0x16f   :  { %v3157_v28 = vmax.f32 %v3149_v25, %v1208_v22  ;;  %v542_v49 = vpop.xlane.xlu1 %541 }
 0x170   :  { %v3160_v40 = vmax.f32 %v3152_v61, %v542_v49 }
 0x171   :  { %3940 = vst [vmem:[#allocation24_spill] sm:$0xff] %v3157_v28  ;;  %1622 = vst.msk [vmem:[#allocation5 + $0x8] sm:$0xff] %vm34_vm1, %v3157_v28  ;;  %1340 = vperm.xlu1 %2148, %v3157_v28  }
 0x172   :  { %3941 = vst [vmem:[#allocation25_spill] sm:$0xff] %v3160_v40  ;;  %952 = vst.msk [vmem:[#allocation2 + $0x30] sm:$0xff] %vm34_vm1, %v3160_v40  ;;  %v1560_v22 = vpop.xlane.xlu0 %1559 }
 0x173   :  { %v1590_v44 = vadd.f32 %v1560_v22, %v1526_v30  ;;  %v895_v49 = vpop.xlane.xlu1 %894  ;;  %v857_v30 = vld [vmem:[#allocation4 + $0x38] sm:$0xff] }
 0x174   :  { %v920_v56 = vadd.f32 %v895_v49, %v856_v31  ;;  %v3198_v49 = vld [vmem:[#allocation5 + $0x20] sm:$0xff] }
 0x175   :  { %1606 = vst.msk [vmem:[#allocation7 + $0x8] sm:$0xff] %vm34_vm1, %v1590_v44  ;;  %v854_v44 = vld [vmem:[#allocation4 + $0x20] sm:$0xff]  ;;  %3948 = vst [vmem:[#allocation32_spill] sm:$0xff] %v3198_v49 }
 0x176   :  { %936 = vst.msk [vmem:[#allocation4 + $0x30] sm:$0xff] %vm34_vm1, %v920_v56  ;;  %v1218_v28 = vpop.xlane.xlu0 %1217  ;;  %v3205_v56 = vld [vmem:[#allocation5 + $0x38] sm:$0xff] }
 0x177   :  { %v3178_v25 = vmax.f32 %v3171_v62, %v1218_v28  ;;  %v538_v11 = vpop.xlane.xlu1 %537  ;;  %3949 = vst [vmem:[#allocation33_spill] sm:$0xff] %v3205_v56 }
 0x178   :  { %v3181_v61 = vmax.f32 %v3174_v15, %v538_v11  ;;  %v3229_v15 = vld [vmem:[#allocation2 + $0x28] sm:$0xff] }
 0x179   :  { %3944 = vst [vmem:[#allocation28_spill] sm:$0xff] %v3178_v25  ;;  %1627 = vst.msk [vmem:[#allocation5 + $0x30] sm:$0xff] %vm34_vm1, %v3178_v25  ;;  %1365 = vperm.xlu1 %2148, %v3178_v25  }
 0x17a   :  { %3945 = vst [vmem:[#allocation29_spill] sm:$0xff] %v3181_v61  ;;  %950 = vst.msk [vmem:[#allocation2 + $0x20] sm:$0xff] %vm34_vm1, %v3181_v61  ;;  %v544_v28 = vpop.xlane.xlu0 %543  ;;  %679 = vperm.xlu0 %2147, %v3181_v61  }
 0x17b   :  { %v3196_v11 = vmax.f32 %v3183_v53, %v544_v28  ;;  %v891_v31 = vpop.xlane.xlu1 %890  ;;  %3953 = vst [vmem:[#allocation37_spill] sm:$0xff] %v3229_v15 }
 0x17c   :  { %v918_v22 = vadd.f32 %v891_v31, %v854_v44 }
 0x17d   :  { %3947 = vst [vmem:[#allocation31_spill] sm:$0xff] %v3196_v11  ;;  %953 = vst.msk [vmem:[#allocation2 + $0x38] sm:$0xff] %vm34_vm1, %v3196_v11  ;;  %694 = vperm.xlu1 %2148, %v3196_v11  }
 0x17e   :  { %934 = vst.msk [vmem:[#allocation4 + $0x20] sm:$0xff] %vm34_vm1, %v918_v22  ;;  %v1214_v61 = vpop.xlane.xlu0 %1213  ;;  %689 = vperm.xlu0 %2147, %v3160_v40   ;;  %v3220_v22 = vld [vmem:[#allocation2 + $0x50] sm:$0xff] }
 0x17f   :  { %v3210_v28 = vmax.f32 %v3198_v49, %v1214_v61  ;;  %v1220_v44 = vpop.xlane.xlu1 %1219  ;;  %3951 = vst [vmem:[#allocation35_spill] sm:$0xff] %v3220_v22  ;;  %v3232_v49 = vld [vmem:[#allocation5 + $0x28] sm:$0xff] }
 0x180   :  { %v3213_v31 = vmax.f32 %v3205_v56, %v1220_v44  ;;  %3954 = vst [vmem:[#allocation38_spill] sm:$0xff] %v3232_v49 }
 0x181   :  { %3950 = vst [vmem:[#allocation34_spill] sm:$0xff] %v3210_v28  ;;  %1625 = vst.msk [vmem:[#allocation5 + $0x20] sm:$0xff] %vm34_vm1, %v3210_v28  ;;  %1355 = vperm.xlu1 %2148, %v3210_v28   ;;  %v860_v28 = vld [vmem:[#allocation4 + $0x50] sm:$0xff] }
 0x182   :  { %1628 = vst.msk [vmem:[#allocation5 + $0x38] sm:$0xff] %vm34_vm1, %v3213_v31  ;;  %v897_v61 = vpop.xlane.xlu0 %896 }
 0x183   :  { %v921_v44 = vadd.f32 %v897_v61, %v857_v30  ;;  %v550_v11 = vpop.xlane.xlu1 %549  ;;  %v855_v61 = vld [vmem:[#allocation4 + $0x28] sm:$0xff] }
 0x184   :  { %v3227_v53 = vmax.f32 %v3220_v22, %v550_v11 }
 0x185   :  { %937 = vst.msk [vmem:[#allocation4 + $0x38] sm:$0xff] %vm34_vm1, %v921_v44  ;;  %v3256_v44 = vld [vmem:[#allocation2 + $0x40] sm:$0xff] }
 0x186   :  { %3952 = vst [vmem:[#allocation36_spill] sm:$0xff] %v3227_v53  ;;  %956 = vst.msk [vmem:[#allocation2 + $0x50] sm:$0xff] %vm34_vm1, %v3227_v53  ;;  %v540_v40 = vpop.xlane.xlu0 %539 }
 0x187   :  { %v3239_v56 = vmax.f32 %v3229_v15, %v540_v40  ;;  %v1216_v30 = vpop.xlane.xlu1 %1215  ;;  %3958 = vst [vmem:[#allocation42_spill] sm:$0xff] %v3256_v44 }
 0x188   :  { %v3242_v11 = vmax.f32 %v3232_v49, %v1216_v30 }
 0x189   :  { %3955 = vst [vmem:[#allocation39_spill] sm:$0xff] %v3239_v56  ;;  %951 = vst.msk [vmem:[#allocation2 + $0x28] sm:$0xff] %vm34_vm1, %v3239_v56  ;;  %684 = vperm.xlu1 %2148, %v3239_v56  }
 0x18a   :  { %3956 = vst [vmem:[#allocation40_spill] sm:$0xff] %v3242_v11  ;;  %1626 = vst.msk [vmem:[#allocation5 + $0x28] sm:$0xff] %vm34_vm1, %v3242_v11  ;;  %v893_v40 = vpop.xlane.xlu0 %892 }
 0x18b   :  { %v919_v25 = vadd.f32 %v893_v40, %v855_v61  ;;  %v903_v30 = vpop.xlane.xlu1 %902 }
 0x18c   :  { %v924_v62 = vadd.f32 %v903_v30, %v860_v28  ;;  %v3280_v30 = vld [vmem:[#allocation5 + $0x40] sm:$0xff]  ;;  %v861_v28 = vld [vmem:[#allocation4 + $0x58] sm:$0xff] }
 0x18d   :  { %935 = vst.msk [vmem:[#allocation4 + $0x28] sm:$0xff] %vm34_vm1, %v919_v25  ;;  %v858_v25 = vld [vmem:[#allocation4 + $0x40] sm:$0xff]  ;;  %3963 = vst [vmem:[#allocation47_spill] sm:$0xff] %v3280_v30 }
 0x18e   :  { %940 = vst.msk [vmem:[#allocation4 + $0x50] sm:$0xff] %vm34_vm1, %v924_v62  ;;  %v1226_v56 = vpop.xlane.xlu0 %1225  ;;  %v3287_v62 = vld [vmem:[#allocation5 + $0x58] sm:$0xff] }
 0x18f   :  { %v3260_v15 = vmax.f32 %v3253_v9, %v1226_v56  ;;  %v546_v22 = vpop.xlane.xlu1 %545  ;;  %3964 = vst [vmem:[#allocation48_spill] sm:$0xff] %v3287_v62 }
 0x190   :  { %v3263_v49 = vmax.f32 %v3256_v44, %v546_v22  ;;  %v3311_v44 = vld [vmem:[#allocation2 + $0x48] sm:$0xff] }
 0x191   :  { %3959 = vst [vmem:[#allocation43_spill] sm:$0xff] %v3260_v15  ;;  %1631 = vst.msk [vmem:[#allocation5 + $0x50] sm:$0xff] %vm34_vm1, %v3260_v15  ;;  %1385 = vperm.xlu1 %2148, %v3260_v15  }
 0x192   :  { %3960 = vst [vmem:[#allocation44_spill] sm:$0xff] %v3263_v49  ;;  %954 = vst.msk [vmem:[#allocation2 + $0x40] sm:$0xff] %vm34_vm1, %v3263_v49  ;;  %v552_v56 = vpop.xlane.xlu0 %551  ;;  %699 = vperm.xlu0 %2147, %v3263_v49  }
 0x193   :  { %v3278_v22 = vmax.f32 %v3265_v51, %v552_v56  ;;  %v899_v61 = vpop.xlane.xlu1 %898  ;;  %3968 = vst [vmem:[#allocation52_spill] sm:$0xff] %v3311_v44 }
 0x194   :  { %v922_v40 = vadd.f32 %v899_v61, %v858_v25 }
 0x195   :  { %3962 = vst [vmem:[#allocation46_spill] sm:$0xff] %v3278_v22  ;;  %957 = vst.msk [vmem:[#allocation2 + $0x58] sm:$0xff] %vm34_vm1, %v3278_v22  ;;  %714 = vperm.xlu1 %2148, %v3278_v22  }
 0x196   :  { %938 = vst.msk [vmem:[#allocation4 + $0x40] sm:$0xff] %vm34_vm1, %v922_v40  ;;  %v1222_v49 = vpop.xlane.xlu0 %1221  ;;  %709 = vperm.xlu0 %2147, %v3227_v53   ;;  %v3302_v40 = vld [vmem:[#allocation2 + $0x70] sm:$0xff] }
 0x197   :  { %v3292_v56 = vmax.f32 %v3280_v30, %v1222_v49  ;;  %v1228_v25 = vpop.xlane.xlu1 %1227  ;;  %3966 = vst [vmem:[#allocation50_spill] sm:$0xff] %v3302_v40  ;;  %v3314_v30 = vld [vmem:[#allocation5 + $0x48] sm:$0xff] }
 0x198   :  { %v3295_v61 = vmax.f32 %v3287_v62, %v1228_v25  ;;  %3969 = vst [vmem:[#allocation53_spill] sm:$0xff] %v3314_v30 }
 0x199   :  { %3965 = vst [vmem:[#allocation49_spill] sm:$0xff] %v3292_v56  ;;  %1629 = vst.msk [vmem:[#allocation5 + $0x40] sm:$0xff] %vm34_vm1, %v3292_v56  ;;  %1375 = vperm.xlu1 %2148, %v3292_v56   ;;  %v864_v56 = vld [vmem:[#allocation4 + $0x70] sm:$0xff] }
 0x19a   :  { %1632 = vst.msk [vmem:[#allocation5 + $0x58] sm:$0xff] %vm34_vm1, %v3295_v61  ;;  %v905_v49 = vpop.xlane.xlu0 %904 }
 0x19b   :  { %v925_v25 = vadd.f32 %v905_v49, %v861_v28  ;;  %v558_v22 = vpop.xlane.xlu1 %557  ;;  %v859_v49 = vld [vmem:[#allocation4 + $0x48] sm:$0xff] }
 0x19c   :  { %v3309_v51 = vmax.f32 %v3302_v40, %v558_v22 }
 0x19d   :  { %941 = vst.msk [vmem:[#allocation4 + $0x58] sm:$0xff] %vm34_vm1, %v925_v25  ;;  %v3338_v25 = vld [vmem:[#allocation2 + $0x60] sm:$0xff] }
 0x19e   :  { %3967 = vst [vmem:[#allocation51_spill] sm:$0xff] %v3309_v51  ;;  %960 = vst.msk [vmem:[#allocation2 + $0x70] sm:$0xff] %vm34_vm1, %v3309_v51  ;;  %v548_v53 = vpop.xlane.xlu0 %547 }
 0x19f   :  { %v3321_v62 = vmax.f32 %v3311_v44, %v548_v53  ;;  %v1224_v28 = vpop.xlane.xlu1 %1223  ;;  %3971 = vst [vmem:[#allocation55_spill] sm:$0xff] %v3338_v25 }
 0x1a0   :  { %v3324_v22 = vmax.f32 %v3314_v30, %v1224_v28 }
 0x1a1   :  { %3970 = vst [vmem:[#allocation54_spill] sm:$0xff] %v3321_v62  ;;  %955 = vst.msk [vmem:[#allocation2 + $0x48] sm:$0xff] %vm34_vm1, %v3321_v62  ;;  %704 = vperm.xlu1 %2148, %v3321_v62  }
 0x1a2   :  { %1630 = vst.msk [vmem:[#allocation5 + $0x48] sm:$0xff] %vm34_vm1, %v3324_v22  ;;  %v901_v53 = vpop.xlane.xlu0 %900 }
 0x1a3   :  { %v923_v15 = vadd.f32 %v901_v53, %v859_v49  ;;  %v911_v28 = vpop.xlane.xlu1 %910 }
 0x1a4   :  { %v928_v9 = vadd.f32 %v911_v28, %v864_v56  ;;  %v3362_v28 = vld [vmem:[#allocation5 + $0x60] sm:$0xff] }
 0x1a5   :  { %939 = vst.msk [vmem:[#allocation4 + $0x48] sm:$0xff] %vm34_vm1, %v923_v15  ;;  %v862_v15 = vld [vmem:[#allocation4 + $0x60] sm:$0xff]  ;;  %3975 = vst [vmem:[#allocation59_spill] sm:$0xff] %v3362_v28 }
 0x1a6   :  { %944 = vst.msk [vmem:[#allocation4 + $0x70] sm:$0xff] %vm34_vm1, %v928_v9  ;;  %v1234_v62 = vpop.xlane.xlu0 %1233  ;;  %v3369_v9 = vld [vmem:[#allocation5 + $0x78] sm:$0xff] }
 0x1a7   :  { %v3342_v44 = vmax.f32 %v3335_v34, %v1234_v62  ;;  %v554_v40 = vpop.xlane.xlu1 %553  ;;  %3976 = vst [vmem:[#allocation60_spill] sm:$0xff] %v3369_v9 }
 0x1a8   :  { %v3345_v30 = vmax.f32 %v3338_v25, %v554_v40 }
 0x1a9   :  { %1635 = vst.msk [vmem:[#allocation5 + $0x70] sm:$0xff] %vm34_vm1, %v3342_v44  ;;  %1405 = vperm.xlu1 %2148, %v3342_v44  }
 0x1aa   :  { %3972 = vst [vmem:[#allocation56_spill] sm:$0xff] %v3345_v30  ;;  %958 = vst.msk [vmem:[#allocation2 + $0x60] sm:$0xff] %vm34_vm1, %v3345_v30  ;;  %v560_v62 = vpop.xlane.xlu0 %559  ;;  %719 = vperm.xlu0 %2147, %v3345_v30  }
 0x1ab   :  { %v3360_v40 = vmax.f32 %v3347_v17, %v560_v62  ;;  %v907_v49 = vpop.xlane.xlu1 %906  ;;  %v3391_v17 = vld [vmem:[#allocation2 + $0x68] sm:$0xff] }
 0x1ac   :  { %v926_v53 = vadd.f32 %v907_v49, %v862_v15  ;;  %v865_v49 = vld [vmem:[#allocation4 + $0x78] sm:$0xff]  ;;  %3979 = vst [vmem:[#allocation63_spill] sm:$0xff] %v3391_v17 }
 0x1ad   :  { %3974 = vst [vmem:[#allocation58_spill] sm:$0xff] %v3360_v40  ;;  %961 = vst.msk [vmem:[#allocation2 + $0x78] sm:$0xff] %vm34_vm1, %v3360_v40  ;;  %734 = vperm.xlu1 %2148, %v3360_v40  }
 0x1ae   :  { %942 = vst.msk [vmem:[#allocation4 + $0x60] sm:$0xff] %vm34_vm1, %v926_v53  ;;  %v1230_v30 = vpop.xlane.xlu0 %1229  ;;  %729 = vperm.xlu0 %2147, %v3309_v51   ;;  %v3384_v53 = vld [vmem:[#allocation5 + $0x68] sm:$0xff] }
 0x1af   :  { %v3374_v62 = vmax.f32 %v3362_v28, %v1230_v30  ;;  %v1236_v15 = vpop.xlane.xlu1 %1235  ;;  %3978 = vst [vmem:[#allocation62_spill] sm:$0xff] %v3384_v53  ;;  %v1528_v28 = vld [vmem:[#allocation7 + $0x18] sm:$0xff] }
 0x1b0   :  { %v3377_v25 = vmax.f32 %v3369_v9, %v1236_v15  ;;  %v1530_v9 = vld [vmem:[#allocation7 + $0x28] sm:$0xff] }
 0x1b1   :  { %3977 = vst [vmem:[#allocation61_spill] sm:$0xff] %v3374_v62  ;;  %1633 = vst.msk [vmem:[#allocation5 + $0x60] sm:$0xff] %vm34_vm1, %v3374_v62  ;;  %1395 = vperm.xlu1 %2148, %v3374_v62  }
 0x1b2   :  { %v913_v40 = vpop.xlane.xlu0 %912  ;;  %1335 = vperm.xlu0 %2147, %v3113_v13   ;;  %1636 = vst.msk [vmem:[#allocation5 + $0x78] sm:$0xff] %vm34_vm1, %v3377_v25 }
 0x1b3   :  { %v929_v15 = vadd.f32 %v913_v40, %v865_v49  ;;  %v1232_v51 = vpop.xlane.xlu1 %1231  ;;  %v863_v40 = vld [vmem:[#allocation4 + $0x68] sm:$0xff] }
 0x1b4   :  { %v3394_v56 = vmax.f32 %v3384_v53, %v1232_v51 }
 0x1b5   :  { %945 = vst.msk [vmem:[#allocation4 + $0x78] sm:$0xff] %vm34_vm1, %v929_v15 }
 0x1b6   :  { %3980 = vst [vmem:[#allocation64_spill] sm:$0xff] %v3394_v56  ;;  %v556_v62 = vpop.xlane.xlu0 %555  ;;  %1350 = vperm.xlu0 %2147, %v3147_v38   ;;  %1634 = vst.msk [vmem:[#allocation5 + $0x68] sm:$0xff] %vm34_vm1, %v3394_v56 }
 0x1b7   :  { %v3403_v30 = vmax.f32 %v3391_v17, %v556_v62 }
 0x1b9   :  { %959 = vst.msk [vmem:[#allocation2 + $0x68] sm:$0xff] %vm34_vm1, %v3403_v30  ;;  %724 = vperm.xlu1 %2148, %v3403_v30  }
 0x1ba   :  { %v909_v51 = vpop.xlane.xlu0 %908  ;;  %1360 = vperm.xlu0 %2147, %v3242_v11  }
 0x1bb   :  { %v927_v15 = vadd.f32 %v909_v51, %v863_v40 }
 0x1bd   :  { %943 = vst.msk [vmem:[#allocation4 + $0x68] sm:$0xff] %vm34_vm1, %v927_v15 }
 0x1be   :  { %v1564_v53 = vpop.xlane.xlu0 %1563  ;;  %1370 = vperm.xlu0 %2147, %v3213_v31  }
 0x1bf   :  { %v1592_v62 = vadd.f32 %v1564_v53, %v1528_v28 }
 0x1c1   :  { %1608 = vst.msk [vmem:[#allocation7 + $0x18] sm:$0xff] %vm34_vm1, %v1592_v62 }
 0x1c2   :  { %v1568_v49 = vpop.xlane.xlu0 %1567  ;;  %1380 = vperm.xlu0 %2147, %v3324_v22  }
 0x1c3   :  { %v1594_v17 = vadd.f32 %v1568_v49, %v1530_v9 }
 0x1c5   :  { %1610 = vst.msk [vmem:[#allocation7 + $0x28] sm:$0xff] %vm34_vm1, %v1594_v17  ;;  %v1543_v17 = vsel %vm219_vm2, %v2768_v63, 0.0 }
 0x1c6   :  { %1390 = vperm.xlu0 %2147, %v3295_v61  }
 0x1ca   :  { %1410 = vperm.xlu0 %2147, %v3377_v25  }
 0x1ce   :  { %1400 = vperm.xlu0 %2147, %v3394_v56  }
 0x1d4   :  { %v670_v40 = vpop.permute.xlu1 %669 }
 0x1d5   :  { %v739_v51 = vsub.f32 %v2593_v43, %v670_v40  ;;  %v1545_v43 = vsel %vm221_vm7, %v2952_v36, 0.0 }
 0x1d7   :  { %v757_v15 = vmul.f32 1.442695, %v739_v51 }
 0x1d8   :  { %v660_v28 = vpop.permute.xlu1 %659 }
 0x1d9   :  { %2169 = vpow2.f32 %v757_v15  ;;  %v737_v53 = vsub.f32 %v2603_v48, %v660_v28 }
 0x1db   :  { %v753_v62 = vmul.f32 1.442695, %v737_v53 }
 0x1dc   :  { %v1346_v11 = vpop.permute.xlu1 %1345 }
 0x1dd   :  { %v1415_v9 = vsub.f32 %v2768_v63, %v1346_v11  ;;  %1561 = vadd.xlane.f32.xlu1 %v1543_v17  ;;  %2171 = vpow2.f32 %v753_v62 }
 0x1df   :  { %v1433_v49 = vmul.f32 1.442695, %v1415_v9 }
 0x1e0   :  { %v675_v56 = vpop.permute.xlu1 %674 }
 0x1e1   :  { %v740_v48 = vsub.f32 %v2618_v54, %v675_v56  ;;  %1565 = vadd.xlane.f32.xlu1 %v1545_v43  ;;  %2173 = vpow2.f32 %v1433_v49 }
 0x1e3   :  { %v759_v40 = vmul.f32 1.442695, %v740_v48 }
 0x1e5   :  { %v665_v51 = vpop.permute.xlu0 %664  ;;  %2175 = vpow2.f32 %v759_v40 }
 0x1e6   :  { %v2170_v15 = vpop.eup %2169  ;;  %v738_v41 = vsub.f32 %v2626_v58, %v665_v51 }
 0x1e7   :  { %789 = vadd.xlane.f32.xlu1 %v2170_v15 }
 0x1e8   :  { %v755_v63 = vmul.f32 1.442695, %v738_v41 }
 0x1ea   :  { %2177 = vpow2.f32 %v755_v63  ;;  %v2172_v11 = vpop.eup %2171 }
 0x1ec   :  { %v1341_v28 = vpop.permute.xlu1 %1340 }
 0x1ed   :  { %v1414_v53 = vsub.f32 %v2867_v42, %v1341_v28  ;;  %785 = vadd.xlane.f32.xlu0 %v2172_v11 }
 0x1ee   :  { %v2174_v62 = vpop.eup %2173 }
 0x1ef   :  { %v1431_v32 = vmul.f32 1.442695, %v1414_v53 }
 0x1f1   :  { %2179 = vpow2.f32 %v1431_v32  ;;  %1465 = vadd.xlane.f32.xlu0 %v2174_v62 }
 0x1f2   :  { %v2176_v54 = vpop.eup %2175 }
 0x1f4   :  { %v1366_v56 = vpop.permute.xlu1 %1365 }
 0x1f5   :  { %v1419_v17 = vsub.f32 %v2923_v21, %v1366_v56  ;;  %791 = vadd.xlane.f32.xlu0 %v2176_v54  ;;  %v3438_v56 = vpop.permute.xlu0 %679 }
 0x1f7   :  { %v2178_v9 = vpop.eup %2177  ;;  %v1441_v58 = vmul.f32 1.442695, %v1419_v17 }
 0x1f8   :  { %v695_v49 = vpop.permute.xlu1 %694 }
 0x1f9   :  { %2181 = vpow2.f32 %v1441_v58  ;;  %v744_v43 = vsub.f32 %v2795_v7, %v695_v49  ;;  %787 = vadd.xlane.f32.xlu0 %v2178_v9 }
 0x1fb   :  { %v767_v48 = vmul.f32 1.442695, %v744_v43  ;;  %v3981_v43 = vmov 0.0  }
 0x1fc   :  { %v1356_v40 = vpop.permute.xlu1 %1355  ;;  %133 = vst.msk [vmem:[%s3866_s8 + $0x10] sm:$0xff] %vm34_vm1, %v3981_v43  ;;  %131 = vst.msk [vmem:[%s3866_s8] sm:$0xff] %vm34_vm1, %v3981_v43 }
 0x1fd   :  { %2183 = vpow2.f32 %v767_v48  ;;  %v1417_v42 = vsub.f32 %v2952_v36, %v1356_v40  ;;  %132 = vst.msk [vmem:[%s3866_s8 + $0x8] sm:$0xff] %vm34_vm1, %v3981_v43  ;;  %134 = vst.msk [vmem:[%s3866_s8 + $0x18] sm:$0xff] %vm34_vm1, %v3981_v43 }
 0x1fe   :  { %v2180_v51 = vpop.eup %2179  ;;  %135 = vst.msk [vmem:[%s3866_s8 + $0x20] sm:$0xff] %vm34_vm1, %v3981_v43  ;;  %136 = vst.msk [vmem:[%s3866_s8 + $0x28] sm:$0xff] %vm34_vm1, %v3981_v43 }
 0x1ff   :  { %v1437_v15 = vmul.f32 1.442695, %v1417_v42  ;;  %1463 = vadd.xlane.f32.xlu0 %v2180_v51  ;;  %137 = vst.msk [vmem:[%s3866_s8 + $0x30] sm:$0xff] %vm34_vm1, %v3981_v43  ;;  %138 = vst.msk [vmem:[%s3866_s8 + $0x38] sm:$0xff] %vm34_vm1, %v3981_v43 }
 0x200   :  { %139 = vst.msk [vmem:[%s3866_s8 + $0x40] sm:$0xff] %vm34_vm1, %v3981_v43  ;;  %140 = vst.msk [vmem:[%s3866_s8 + $0x48] sm:$0xff] %vm34_vm1, %v3981_v43 }
 0x201   :  { %2185 = vpow2.f32 %v1437_v15  ;;  %141 = vst.msk [vmem:[%s3866_s8 + $0x50] sm:$0xff] %vm34_vm1, %v3981_v43  ;;  %142 = vst.msk [vmem:[%s3866_s8 + $0x58] sm:$0xff] %vm34_vm1, %v3981_v43 }
 0x202   :  { %143 = vst.msk [vmem:[%s3866_s8 + $0x60] sm:$0xff] %vm34_vm1, %v3981_v43  ;;  %144 = vst.msk [vmem:[%s3866_s8 + $0x68] sm:$0xff] %vm34_vm1, %v3981_v43 }
 0x203   :  { %145 = vst.msk [vmem:[%s3866_s8 + $0x70] sm:$0xff] %vm34_vm1, %v3981_v43  ;;  %146 = vst.msk [vmem:[%s3866_s8 + $0x78] sm:$0xff] %vm34_vm1, %v3981_v43 }
 0x204   :  { %v685_v41 = vpop.permute.xlu1 %684 }
 0x205   :  { %v742_v63 = vsub.f32 %v2805_v12, %v685_v41 }
 0x206   :  { %v2182_v11 = vpop.eup %2181 }
 0x207   :  { %v763_v28 = vmul.f32 1.442695, %v742_v63  ;;  %1473 = vadd.xlane.f32.xlu0 %v2182_v11 }
 0x209   :  { %2187 = vpow2.f32 %v763_v28 }
 0x20a   :  { %v2184_v53 = vpop.eup %2183 }
 0x20b   :  { %799 = vadd.xlane.f32.xlu0 %v2184_v53 }
 0x20c   :  { %v1386_v7 = vpop.permute.xlu1 %1385 }
 0x20d   :  { %v1423_v32 = vsub.f32 %v2994_v19, %v1386_v7 }
 0x20e   :  { %v2186_v62 = vpop.eup %2185 }
 0x20f   :  { %v1449_v54 = vmul.f32 1.442695, %v1423_v32  ;;  %1469 = vadd.xlane.f32.xlu0 %v2186_v62 }
 0x210   :  { %v715_v36 = vpop.permute.xlu1 %714 }
 0x211   :  { %2189 = vpow2.f32 %v1449_v54  ;;  %v748_v17 = vsub.f32 %v2843_v27, %v715_v36  ;;  %v690_v27 = vpop.permute.xlu0 %689 }
 0x213   :  { %v775_v9 = vmul.f32 1.442695, %v748_v17 }
 0x214   :  { %v1376_v12 = vpop.permute.xlu1 %1375 }
 0x215   :  { %2191 = vpow2.f32 %v775_v9  ;;  %v1421_v58 = vsub.f32 %v3012_v3, %v1376_v12  ;;  %v3522_v40 = vpop.permute.xlu0 %699 }
 0x216   :  { %v2188_v49 = vpop.eup %2187 }
 0x217   :  { %v1445_v48 = vmul.f32 1.442695, %v1421_v58  ;;  %795 = vadd.xlane.f32.xlu0 %v2188_v49 }
 0x219   :  { %2193 = vpow2.f32 %v1445_v48  ;;  %v710_v63 = vpop.permute.xlu0 %709 }
 0x21c   :  { %v705_v42 = vpop.permute.xlu1 %704 }
 0x21d   :  { %v746_v51 = vsub.f32 %v2862_v35, %v705_v42 }
 0x21e   :  { %v2190_v15 = vpop.eup %2189 }
 0x21f   :  { %v771_v41 = vmul.f32 1.442695, %v746_v51  ;;  %1481 = vadd.xlane.f32.xlu0 %v2190_v15  ;;  %v743_v15 = vsub.f32 %v2792_v6, %v690_v27 }
 0x221   :  { %2195 = vpow2.f32 %v771_v41 }
 0x222   :  { %v2192_v11 = vpop.eup %2191 }
 0x223   :  { %807 = vadd.xlane.f32.xlu0 %v2192_v11 }
 0x224   :  { %v1406_v28 = vpop.permute.xlu1 %1405 }
 0x225   :  { %v1427_v53 = vsub.f32 %v2883_v52, %v1406_v28  ;;  %v3526_v7 = vpop.permute.xlu0 %719 }
 0x226   :  { %v2194_v32 = vpop.eup %2193  ;;  %v749_v55 = vsub.f32 %v2907_v1, %v3526_v7  ;;  %v3982_v7 = vsub.f32 %v3083_v37, %v3086_v50  ;;  %v1527_v37 = vld [vmem:[#allocation7 + $0x10] sm:$0xff]  ;;  %v3984_v50 = vld [vmem:[#allocation14_spill] sm:$0xff] }
 0x227   :  { %v1457_v62 = vmul.f32 1.442695, %v1427_v53  ;;  %1477 = vadd.xlane.f32.xlu0 %v2194_v32 }
 0x228   :  { %v735_v54 = vpop.permute.xlu1 %734 }
 0x229   :  { %2197 = vpow2.f32 %v1457_v62  ;;  %v752_v36 = vsub.f32 %v2895_v60, %v735_v54  ;;  %v3529_v35 = vpop.permute.xlu0 %729  ;;  %v741_v62 = vsub.f32 %v2800_v10, %v3438_v56 }
 0x22b   :  { %v783_v17 = vmul.f32 1.442695, %v752_v36  ;;  %v761_v6 = vmul.f32 1.442695, %v741_v62  ;;  %v777_v62 = vmul.f32 1.442695, %v749_v55 }
 0x22c   :  { %v1396_v9 = vpop.permute.xlu1 %1395 }
 0x22d   :  { %2199 = vpow2.f32 %v783_v17  ;;  %v1425_v12 = vsub.f32 %v2898_v0, %v1396_v9  ;;  %v1336_v58 = vpop.permute.xlu0 %1335 }
 0x22e   :  { %v2196_v49 = vpop.eup %2195  ;;  %v1413_v43 = vsub.f32 %v2782_v2, %v1336_v58  ;;  %v765_v2 = vmul.f32 1.442695, %v743_v15 }
 0x22f   :  { %v1453_v48 = vmul.f32 1.442695, %v1425_v12  ;;  %803 = vadd.xlane.f32.xlu0 %v2196_v49 }
 0x230   :  { %v1429_v42 = vmul.f32 1.442695, %v1413_v43 }
 0x231   :  { %2201 = vpow2.f32 %v1453_v48  ;;  %v1351_v51 = vpop.permute.xlu0 %1350  ;;  %v745_v48 = vsub.f32 %v2857_v33, %v3522_v40  ;;  %v751_v33 = vsub.f32 %v2892_v59, %v3529_v35 }
 0x232   :  { %2203 = vpow2.f32 %v1429_v42  ;;  %v1416_v60 = vsub.f32 %v2849_v29, %v1351_v51 }
 0x234   :  { %v1435_v41 = vmul.f32 1.442695, %v1416_v60  ;;  %v725_v11 = vpop.permute.xlu1 %724 }
 0x235   :  { %v750_v28 = vsub.f32 %v2912_v14, %v725_v11  ;;  %v1361_v53 = vpop.permute.xlu0 %1360  ;;  %v747_v14 = vsub.f32 %v2840_v26, %v710_v63  ;;  %v769_v26 = vmul.f32 1.442695, %v745_v48 }
 0x236   :  { %v2198_v32 = vpop.eup %2197  ;;  %2205 = vpow2.f32 %v1435_v41  ;;  %v1418_v58 = vsub.f32 %v2973_v46, %v1361_v53  ;;  %v1548_v46 = vsel %vm224_vm8, %v2955_v4, 0.0  ;;  %v1550_v41 = vsel %vm226_vm13, %v2875_v47, 0.0 }
 0x237   :  { %v779_v54 = vmul.f32 1.442695, %v750_v28  ;;  %1489 = vadd.xlane.f32.xlu0 %v2198_v32  ;;  %v773_v56 = vmul.f32 1.442695, %v747_v14  ;;  %v781_v28 = vmul.f32 1.442695, %v751_v33 }
 0x238   :  { %v1439_v42 = vmul.f32 1.442695, %v1418_v58  ;;  %v3987_v58 = vld [vmem:[#allocation17_spill] sm:$0xff] }
 0x239   :  { %2207 = vpow2.f32 %v779_v54  ;;  %v1371_v36 = vpop.permute.xlu0 %1370 }
 0x23a   :  { %v2200_v17 = vpop.eup %2199  ;;  %2209 = vpow2.f32 %v765_v2  ;;  %v1420_v29 = vsub.f32 %v2955_v4, %v1371_v36  ;;  %v1552_v4 = vsel %vm228_vm12, %v3015_v23, 0.0  ;;  %v597_v2 = vmul.f32 1.442695, %v3982_v7 }
 0x23b   :  { %815 = vadd.xlane.f32.xlu0 %v2200_v17  ;;  %2211 = vpow2.f32 %v761_v6  ;;  %v3983_v6 = vsub.f32 %v3088_v57, %v3097_v5  ;;  %v3988_v57 = vld [vmem:[#allocation18_spill] sm:$0xff]  ;;  %v1547_v7 = vsel %vm223_vm6, %v2923_v21, 0.0 }
 0x23c   :  { %v1443_v9 = vmul.f32 1.442695, %v1420_v29  ;;  %v3989_v5 = vsub.f32 %v3987_v58, %v3988_v57 }
 0x23d   :  { %v1381_v10 = vpop.permute.xlu0 %1380  ;;  %v593_v20 = vmul.f32 1.442695, %v3983_v6  ;;  %v3997_v6 = vld [vmem:[#allocation26_spill] sm:$0xff] }
 0x23e   :  { %v2202_v27 = vpop.eup %2201  ;;  %2213 = vpow2.f32 %v1443_v9  ;;  %v1422_v8 = vsub.f32 %v2875_v47, %v1381_v10  ;;  %v1554_v47 = vsel %vm230_vm3, %v2931_v24, 0.0 }
 0x23f   :  { %v2204_v12 = vpop.eup %2203  ;;  %1485 = vadd.xlane.f32.xlu0 %v2202_v27  ;;  %2215 = vpow2.f32 %v773_v56  ;;  %v3985_v27 = vld [vmem:[#allocation16_spill] sm:$0xff]  ;;  %v1529_v56 = vld [vmem:[#allocation7 + $0x20] sm:$0xff] }
 0x240   :  { %1461 = vadd.xlane.f32.xlu1 %v2204_v12  ;;  %2217 = vpow2.f32 %v1439_v42  ;;  %v1447_v35 = vmul.f32 1.442695, %v1422_v8  ;;  %v3986_v14 = vsub.f32 %v3984_v50, %v3985_v27  ;;  %v625_v8 = vld [vmem:[#allocation3] sm:$0xff]  ;;  %v1549_v27 = vsel %vm225_vm11, %v3012_v3, 0.0  ;;  %v1722_v50 = vld [vmem:[#allocation4 + $0x10] sm:$0xff] }
 0x241   :  { %v1391_v15 = vpop.permute.xlu0 %1390  ;;  %2219 = vpow2.f32 %v769_v26  ;;  %v3990_v26 = vld [vmem:[#allocation19_spill] sm:$0xff] }
 0x242   :  { %v1424_v63 = vsub.f32 %v3015_v23, %v1391_v15  ;;  %v1273_v9 = vmul.f32 1.442695, %v3986_v14  ;;  %v627_v15 = vld [vmem:[#allocation3 + $0x10] sm:$0xff] }
 0x243   :  { %v2206_v49 = vpop.eup %2205 }
 0x244   :  { %1467 = vadd.xlane.f32.xlu1 %v2206_v49  ;;  %v1451_v40 = vmul.f32 1.442695, %v1424_v63  ;;  %v599_v49 = vmul.f32 1.442695, %v3989_v5  ;;  %v3991_v63 = vld [vmem:[#allocation20_spill] sm:$0xff] }
 0x245   :  { %v1411_v59 = vpop.permute.xlu0 %1410 }
 0x246   :  { %v2208_v43 = vpop.eup %2207  ;;  %2221 = vpow2.f32 %v1451_v40  ;;  %v1428_v23 = vsub.f32 %v2919_v18, %v1411_v59  ;;  %v3994_v59 = vld [vmem:[#allocation24_spill] sm:$0xff] }
 0x247   :  { %v2210_v51 = vpop.eup %2209  ;;  %811 = vadd.xlane.f32.xlu0 %v2208_v43  ;;  %2223 = vpow2.f32 %v781_v28 }
 0x248   :  { %797 = vadd.xlane.f32.xlu1 %v2210_v51  ;;  %v2212_v60 = vpop.eup %2211  ;;  %2225 = vpow2.f32 %v1447_v35  ;;  %v1459_v16 = vmul.f32 1.442695, %v1428_v23  ;;  %v1303_v23 = vld [vmem:[#allocation6 + $0x10] sm:$0xff] }
 0x249   :  { %v1401_v54 = vpop.permute.xlu0 %1400  ;;  %2227 = vpow2.f32 %v777_v62 }
 0x24a   :  { %v1426_v36 = vsub.f32 %v2931_v24, %v1401_v54  ;;  %2229 = vpow2.f32 %v597_v2 }
 0x24b   :  { %1571 = vadd.xlane.f32.xlu0 %v1548_v46  ;;  %v2214_v11 = vpop.eup %2213  ;;  %2231 = vpow2.f32 %v1459_v16  ;;  %v3992_v46 = vsub.f32 %v3990_v26, %v3991_v63  ;;  %v4019_v63 = vld [vmem:[#allocation47_spill] sm:$0xff] }
 0x24c   :  { %793 = vadd.xlane.f32.xlu1 %v2212_v60  ;;  %v2216_v53 = vpop.eup %2215  ;;  %v1455_v18 = vmul.f32 1.442695, %v1426_v36  ;;  %2233 = vpow2.f32 %v593_v20  ;;  %v3998_v20 = vld [vmem:[#allocation28_spill] sm:$0xff] }
 0x24d   :  { %v2218_v32 = vpop.eup %2217  ;;  %v595_v60 = vmul.f32 1.442695, %v3992_v46  ;;  %v1553_v46 = vsel %vm229_vm15, %v2898_v0, 0.0  ;;  %v4011_v0 = vld [vmem:[#allocation39_spill] sm:$0xff] }
 0x24e   :  { %v2220_v1 = vpop.eup %2219  ;;  %2235 = vpow2.f32 %v1455_v18  ;;  %v3999_v18 = vsub.f32 %v3997_v6, %v3998_v20 }
 0x24f   :  { %1575 = vadd.xlane.f32.xlu0 %v1550_v41  ;;  %2237 = vpow2.f32 %v1273_v9 }
 0x250   :  { %1475 = vadd.xlane.f32.xlu1 %v2214_v11  ;;  %2239 = vpow2.f32 %v599_v49  ;;  %v1551_v49 = vsel %vm227_vm10, %v2994_v19, 0.0  ;;  %v1302_v19 = vld [vmem:[#allocation6 + $0x8] sm:$0xff] }
 0x251   :  { %2241 = vpow2.f32 %v595_v60 }
 0x253   :  { %1579 = vadd.xlane.f32.xlu0 %v1552_v4  ;;  %v2222_v17 = vpop.eup %2221 }
 0x254   :  { %805 = vadd.xlane.f32.xlu1 %v2216_v53  ;;  %v2224_v29 = vpop.eup %2223  ;;  %v3993_v53 = vld [vmem:[#allocation22_spill] sm:$0xff] }
 0x255   :  { %v2226_v24 = vpop.eup %2225  ;;  %v3995_v55 = vsub.f32 %v3993_v53, %v3994_v59  ;;  %v4010_v53 = vld [vmem:[#allocation37_spill] sm:$0xff] }
 0x256   :  { %v2228_v48 = vpop.eup %2227  ;;  %v4012_v59 = vsub.f32 %v4010_v53, %v4011_v0 }
 0x257   :  { %1583 = vadd.xlane.f32.xlu0 %v1554_v47  ;;  %v2230_v51 = vpop.eup %2229  ;;  %v1271_v35 = vmul.f32 1.442695, %v3995_v55 }
 0x258   :  { %1471 = vadd.xlane.f32.xlu1 %v2218_v32  ;;  %v2232_v33 = vpop.eup %2231  ;;  %v643_v40 = vmul.f32 %v2230_v51, %v627_v15  ;;  %v603_v55 = vmul.f32 1.442695, %v4012_v59 }
 0x259   :  { %v2234_v28 = vpop.eup %2233  ;;  %2243 = vpow2.f32 %v1271_v35 }
 0x25a   :  { %v641_v47 = vmul.f32 %v2234_v28, %v625_v8 }
 0x25b   :  { %1587 = vadd.xlane.f32.xlu0 %v1556_v45  ;;  %v2236_v4 = vpop.eup %2235 }
 0x25c   :  { %801 = vadd.xlane.f32.xlu1 %v2220_v1  ;;  %v2238_v32 = vpop.eup %2237  ;;  %v632_v1 = vld [vmem:[#allocation3 + $0x38] sm:$0xff] }
 0x25d   :  { %v1319_v2 = vmul.f32 %v2238_v32, %v1303_v23  ;;  %v2240_v54 = vpop.eup %2239  ;;  %v1307_v32 = vld [vmem:[#allocation6 + $0x30] sm:$0xff] }
 0x25e   :  { %v2242_v14 = vpop.eup %2241 }
 0x260   :  { %1483 = vadd.xlane.f32.xlu1 %v2222_v17  ;;  %v628_v17 = vld [vmem:[#allocation3 + $0x18] sm:$0xff] }
 0x261   :  { %v644_v21 = vmul.f32 %v2240_v54, %v628_v17  ;;  %v4014_v17 = vld [vmem:[#allocation43_spill] sm:$0xff] }
 0x264   :  { %813 = vadd.xlane.f32.xlu1 %v2224_v29  ;;  %v1281_v29 = vmul.f32 1.442695, %v3999_v18 }
 0x266   :  { %v1562_v12 = vpop.xlane.xlu1 %1561  ;;  %v2244_v60 = vpop.eup %2243 }
 0x267   :  { %v1591_v10 = vadd.f32 %v1562_v12, %v1527_v37  ;;  %v626_v12 = vld [vmem:[#allocation3 + $0x8] sm:$0xff] }
 0x268   :  { %1479 = vadd.xlane.f32.xlu1 %v2226_v24  ;;  %v4001_v24 = vld [vmem:[#allocation30_spill] sm:$0xff]  ;;  %v642_v3 = vmul.f32 %v2242_v14, %v626_v12  ;;  %v1305_v14 = vld [vmem:[#allocation6 + $0x20] sm:$0xff] }
 0x269   :  { %1607 = vst.msk [vmem:[#allocation7 + $0x10] sm:$0xff] %vm34_vm1, %v1591_v10  ;;  %v4002_v10 = vld [vmem:[#allocation31_spill] sm:$0xff] }
 0x26a   :  { %v1566_v43 = vpop.xlane.xlu1 %1565 }
 0x26b   :  { %v1593_v42 = vadd.f32 %v1566_v43, %v1529_v56  ;;  %v4003_v56 = vsub.f32 %v4001_v24, %v4002_v10 }
 0x26c   :  { %809 = vadd.xlane.f32.xlu1 %v2228_v48  ;;  %v4005_v48 = vld [vmem:[#allocation32_spill] sm:$0xff] }
 0x26d   :  { %1609 = vst.msk [vmem:[#allocation7 + $0x20] sm:$0xff] %vm34_vm1, %v1593_v42  ;;  %v607_v58 = vmul.f32 1.442695, %v4003_v56  ;;  %v4006_v42 = vld [vmem:[#allocation34_spill] sm:$0xff]  ;;  %v4016_v56 = vld [vmem:[#allocation45_spill] sm:$0xff] }
 0x26e   :  { %v4007_v51 = vsub.f32 %v4005_v48, %v4006_v42 }
 0x270   :  { %1491 = vadd.xlane.f32.xlu1 %v2232_v33  ;;  %v790_v41 = vpop.xlane.xlu1 %789  ;;  %v1277_v15 = vmul.f32 1.442695, %v4007_v51  ;;  %v1834_v10 = vld [vmem:[#allocation7 + $0x10] sm:$0xff] }
 0x271   :  { %v819_v11 = vadd.f32 %v790_v41, %v643_v40  ;;  %v1555_v41 = vsel %vm231_vm14, %v2883_v52, 0.0  ;;  %v1642_v52 = vld [vmem:[#allocation2 + $0x10] sm:$0xff] }
 0x273   :  { %836 = vst.msk [vmem:[#allocation3 + $0x10] sm:$0xff] %vm34_vm1, %v819_v11  ;;  %v1318_v11 = vmul.f32 %v2244_v60, %v1302_v19 }
 0x274   :  { %1487 = vadd.xlane.f32.xlu1 %v2236_v4 }
 0x276   :  { %v786_v62 = vpop.xlane.xlu0 %785 }
 0x277   :  { %v817_v45 = vadd.f32 %v786_v62, %v641_v47 }
 0x278   :  { %1569 = vadd.xlane.f32.xlu1 %v1547_v7 }
 0x279   :  { %834 = vst.msk [vmem:[#allocation3] sm:$0xff] %vm34_vm1, %v817_v45 }
 0x27a   :  { %v1658_v16 = vld [vmem:[#allocation3 + $0x10] sm:$0xff]  ;;  %v1466_v36 = vpop.xlane.xlu0 %1465 }
 0x27b   :  { %v1495_v37 = vadd.f32 %v1466_v36, %v1319_v2  ;;  %2245 = vlog2.f32 %v1658_v16  ;;  %v4013_v36 = vld [vmem:[#allocation41_spill] sm:$0xff] }
 0x27c   :  { %1573 = vadd.xlane.f32.xlu1 %v1549_v27  ;;  %2247 = vpow2.f32 %v1281_v29  ;;  %v4015_v6 = vsub.f32 %v4013_v36, %v4014_v17  ;;  %v1754_v27 = vld [vmem:[#allocation5 + $0x10] sm:$0xff] }
 0x27d   :  { %1511 = vst.msk [vmem:[#allocation6 + $0x10] sm:$0xff] %vm34_vm1, %v1495_v37  ;;  %2249 = vpow2.f32 %v607_v58  ;;  %v4017_v58 = vld [vmem:[#allocation46_spill] sm:$0xff] }
 0x27e   :  { %v792_v9 = vpop.xlane.xlu0 %791  ;;  %v1289_v20 = vmul.f32 1.442695, %v4015_v6 }
 0x27f   :  { %v820_v57 = vadd.f32 %v792_v9, %v644_v21 }
 0x280   :  { %1577 = vadd.xlane.f32.xlu1 %v1551_v49 }
 0x281   :  { %837 = vst.msk [vmem:[#allocation3 + $0x18] sm:$0xff] %vm34_vm1, %v820_v57  ;;  %v4018_v57 = vsub.f32 %v4016_v56, %v4017_v58  ;;  %v1309_v56 = vld [vmem:[#allocation6 + $0x40] sm:$0xff] }
 0x282   :  { %v788_v43 = vpop.xlane.xlu0 %787 }
 0x283   :  { %v818_v26 = vadd.f32 %v788_v43, %v642_v3  ;;  %v615_v5 = vmul.f32 1.442695, %v4018_v57  ;;  %v4026_v57 = vld [vmem:[#allocation57_spill] sm:$0xff] }
 0x284   :  { %v1770_v33 = vld [vmem:[#allocation6 + $0x10] sm:$0xff]  ;;  %1581 = vadd.xlane.f32.xlu1 %v1553_v46  ;;  %v4020_v46 = vld [vmem:[#allocation49_spill] sm:$0xff] }
 0x285   :  { %2251 = vlog2.f32 %v1770_v33  ;;  %835 = vst.msk [vmem:[#allocation3 + $0x8] sm:$0xff] %vm34_vm1, %v818_v26  ;;  %v2361_v26 = vld [vmem:[%s3862_s6 + $0x10] sm:$0xff]  ;;  %v4021_v60 = vsub.f32 %v4019_v63, %v4020_v46 }
 0x286   :  { %2253 = vpow2.f32 %v1277_v15  ;;  %vm1914_vm2 = vcmp.ge.s32.totalorder %v2361_v26, 0 }
 0x287   :  { %v1285_v33 = vmul.f32 1.442695, %v4021_v60 }
 0x288   :  { %1585 = vadd.xlane.f32.xlu1 %v1555_v41  ;;  %v1464_v28 = vpop.xlane.xlu0 %1463  ;;  %v2246_v4 = vpop.eup %2245 }
 0x289   :  { %v1494_v8 = vadd.f32 %v1464_v28, %v1318_v11  ;;  %v2248_v35 = vpop.eup %2247  ;;  %v1677_v62 = vmul.f32 0.6931472, %v2246_v4  ;;  %v630_v11 = vld [vmem:[#allocation3 + $0x28] sm:$0xff] }
 0x28a   :  { %v1323_v23 = vmul.f32 %v2248_v35, %v1307_v32  ;;  %v2250_v39 = vpop.eup %2249  ;;  %v1753_v32 = vld [vmem:[#allocation5 + $0x8] sm:$0xff] }
 0x28b   :  { %1510 = vst.msk [vmem:[#allocation6 + $0x8] sm:$0xff] %vm34_vm1, %v1494_v8  ;;  %v1706_v7 = vadd.f32 %v1677_v62, %v1642_v52  ;;  %v648_v29 = vmul.f32 %v2250_v39, %v632_v1  ;;  %v1641_v8 = vld [vmem:[#allocation2 + $0x8] sm:$0xff]  ;;  %v4022_v62 = vld [vmem:[#allocation52_spill] sm:$0xff] }
 0x28c   :  { %v1657_v47 = vld [vmem:[#allocation3 + $0x8] sm:$0xff] }
 0x28d   :  { %2255 = vlog2.f32 %v1657_v47  ;;  %v1738_v9 = vsub.f32 %v1706_v7, %v1722_v50  ;;  %v1721_v47 = vld [vmem:[#allocation4 + $0x8] sm:$0xff] }
 0x28e   :  { %2257 = vpow2.f32 %v603_v55 }
 0x28f   :  { %v1866_v48 = vmul.f32 0.8, %v1738_v9 }
 0x290   :  { %v1474_v45 = vpop.xlane.xlu0 %1473 }
 0x291   :  { %v1499_v2 = vadd.f32 %v1474_v45, %v1323_v23  ;;  %v4023_v23 = vld [vmem:[#allocation54_spill] sm:$0xff] }
 0x292   :  { %v2252_v54 = vpop.eup %2251  ;;  %v1769_v16 = vld [vmem:[#allocation6 + $0x8] sm:$0xff]  ;;  %v4024_v39 = vsub.f32 %v4022_v62, %v4023_v23  ;;  %v4039_v23 = vld [vmem:[#allocation27_spill] sm:$0xff] }
 0x293   :  { %v1789_v18 = vmul.f32 0.6931472, %v2252_v54  ;;  %2259 = vlog2.f32 %v1769_v16  ;;  %1515 = vst.msk [vmem:[#allocation6 + $0x30] sm:$0xff] %vm34_vm1, %v1499_v2  ;;  %v2254_v37 = vpop.eup %2253  ;;  %v1833_v2 = vld [vmem:[#allocation7 + $0x8] sm:$0xff]  ;;  %v1311_v54 = vld [vmem:[#allocation6 + $0x50] sm:$0xff] }
 0x294   :  { %v800_v21 = vpop.xlane.xlu0 %799  ;;  %2261 = vpow2.f32 %v1289_v20  ;;  %v1321_v3 = vmul.f32 %v2254_v37, %v1305_v14  ;;  %v611_v52 = vmul.f32 1.442695, %v4024_v39  ;;  %v636_v37 = vld [vmem:[#allocation3 + $0x58] sm:$0xff]  ;;  %v4040_v39 = vld [vmem:[#allocation29_spill] sm:$0xff] }
 0x295   :  { %v1818_v12 = vadd.f32 %v1789_v18, %v1754_v27  ;;  %v824_v24 = vadd.f32 %v800_v21, %v648_v29  ;;  %2263 = vpow2.f32 %v615_v5  ;;  %v2362_v18 = vld [vmem:[%s3862_s6 + $0x8] sm:$0xff]  ;;  %v4025_v21 = vsub.f32 %v3335_v34, %v3342_v44  ;;  %v4029_v44 = vld [vmem:[#allocation15_spill] sm:$0xff] }
 0x296   :  { %2265 = vpow2.f32 %v1285_v33  ;;  %vm1913_vm4 = vcmp.ge.s32.totalorder %v2362_v18, 0  ;;  %v4027_v5 = vld [vmem:[#allocation58_spill] sm:$0xff]  ;;  %v4033_v33 = vld [vmem:[#allocation21_spill] sm:$0xff] }
 0x297   :  { %v1850_v49 = vsub.f32 %v1818_v12, %v1834_v10  ;;  %841 = vst.msk [vmem:[#allocation3 + $0x38] sm:$0xff] %vm34_vm1, %v824_v24  ;;  %2267 = vpow2.f32 %v611_v52  ;;  %v1297_v14 = vmul.f32 1.442695, %v4025_v21  ;;  %v4041_v52 = vsub.f32 %v4039_v23, %v4040_v39 }
 0x298   :  { %v1470_v43 = vpop.xlane.xlu0 %1469 }
 0x299   :  { %v1882_v42 = vmul.f32 0.2, %v1850_v49  ;;  %v1497_v51 = vadd.f32 %v1470_v43, %v1321_v3  ;;  %2269 = vpow2.f32 %v1297_v14  ;;  %v4028_v49 = vsub.f32 %v4026_v57, %v4027_v5  ;;  %v1304_v57 = vld [vmem:[#allocation6 + $0x18] sm:$0xff] }
 0x29a   :  { %v2256_v15 = vpop.eup %2255  ;;  %v1253_v43 = vsub.f32 %v4029_v44, %v3113_v13 }
 0x29b   :  { %v1898_v19 = vadd.f32 %v1882_v42, %v1866_v48  ;;  %v1675_v40 = vmul.f32 0.6931472, %v2256_v15  ;;  %1513 = vst.msk [vmem:[#allocation6 + $0x20] sm:$0xff] %vm34_vm1, %v1497_v51  ;;  %v2258_v41 = vpop.eup %2257  ;;  %v623_v3 = vmul.f32 1.442695, %v4028_v49  ;;  %v4030_v51 = vld [vmem:[#allocation59_spill] sm:$0xff] }
 0x29c   :  { %v646_v53 = vmul.f32 %v2258_v41, %v630_v11  ;;  %v4031_v15 = vld [vmem:[#allocation61_spill] sm:$0xff]  ;;  %v1269_v60 = vmul.f32 1.442695, %v1253_v43  ;;  %v4047_v49 = vld [vmem:[#allocation38_spill] sm:$0xff] }
 0x29d   :  { %v1930_v28 = vsel %vm1914_vm2, %v1898_v19, 0.0  ;;  %v1705_v4 = vadd.f32 %v1675_v40, %v1641_v8  ;;  %2271 = vpow2.f32 %v623_v3  ;;  %v4032_v26 = vsub.f32 %v4030_v51, %v4031_v15  ;;  %v634_v40 = vld [vmem:[#allocation3 + $0x48] sm:$0xff]  ;;  %v4034_v8 = vld [vmem:[#allocation63_spill] sm:$0xff]  ;;  %v4048_v3 = vld [vmem:[#allocation40_spill] sm:$0xff] }
 0x29e   :  { %1946 = vst.msk [vmem:[%s3866_s8 + $0x10] sm:$0xff] %vm34_vm1, %v1930_v28  ;;  %v1256_v19 = vsub.f32 %v4033_v33, %v3147_v38  ;;  %v1315_v38 = vld [vmem:[#allocation6 + $0x70] sm:$0xff]  ;;  %v1659_v15 = vld [vmem:[#allocation3 + $0x18] sm:$0xff] }
 0x29f   :  { %v1737_v45 = vsub.f32 %v1705_v4, %v1721_v47  ;;  %v1293_v63 = vmul.f32 1.442695, %v4032_v26  ;;  %v4035_v4 = vsub.f32 %v4034_v8, %v3403_v30  ;;  %v640_v30 = vld [vmem:[#allocation3 + $0x78] sm:$0xff] }
 0x2a0   :  { %v2260_v0 = vpop.eup %2259  ;;  %v796_v59 = vpop.xlane.xlu0 %795  ;;  %v1275_v11 = vmul.f32 1.442695, %v1256_v19  ;;  %v4051_v33 = vld [vmem:[#allocation44_spill] sm:$0xff] }
 0x2a1   :  { %v1787_v55 = vmul.f32 0.6931472, %v2260_v0  ;;  %v822_v35 = vadd.f32 %v796_v59, %v646_v53  ;;  %v2262_v7 = vpop.eup %2261  ;;  %v1865_v36 = vmul.f32 0.8, %v1737_v45  ;;  %2273 = vpow2.f32 %v1293_v63  ;;  %v4036_v59 = vld [vmem:[#allocation23_spill] sm:$0xff] }
 0x2a2   :  { %v1327_v6 = vmul.f32 %v2262_v7, %v1311_v54  ;;  %v2264_v20 = vpop.eup %2263  ;;  %2275 = vpow2.f32 %v1269_v60  ;;  %v619_v53 = vmul.f32 1.442695, %v4035_v4  ;;  %v601_v45 = vmul.f32 1.442695, %v4041_v52  ;;  %v631_v63 = vld [vmem:[#allocation3 + $0x30] sm:$0xff]  ;;  %v4050_v60 = vld [vmem:[#allocation42_spill] sm:$0xff] }
 0x2a3   :  { %v1817_v1 = vadd.f32 %v1787_v55, %v1753_v32  ;;  %839 = vst.msk [vmem:[#allocation3 + $0x28] sm:$0xff] %vm34_vm1, %v822_v35  ;;  %v652_v12 = vmul.f32 %v2264_v20, %v636_v37  ;;  %v2266_v24 = vpop.eup %2265  ;;  %2277 = vpow2.f32 %v1275_v11  ;;  %v4037_v55 = vld [vmem:[#allocation25_spill] sm:$0xff]  ;;  %v4052_v19 = vsub.f32 %v4050_v60, %v4051_v33 }
 0x2a4   :  { %v1325_v34 = vmul.f32 %v2266_v24, %v1309_v56  ;;  %v2268_v46 = vpop.eup %2267  ;;  %v4038_v35 = vsub.f32 %v4036_v59, %v4037_v55  ;;  %2279 = vpow2.f32 %v619_v53  ;;  %v1313_v20 = vld [vmem:[#allocation6 + $0x60] sm:$0xff] }
 0x2a5   :  { %v1849_v16 = vsub.f32 %v1817_v1, %v1833_v2  ;;  %v650_v41 = vmul.f32 %v2268_v46, %v634_v40  ;;  %v1301_v37 = vld [vmem:[#allocation6] sm:$0xff]  ;;  %v609_v40 = vmul.f32 1.442695, %v4052_v19 }
 0x2a6   :  { %v2270_v0 = vpop.eup %2269  ;;  %v605_v47 = vmul.f32 1.442695, %v4038_v35  ;;  %v1656_v56 = vld [vmem:[#allocation3] sm:$0xff] }
 0x2a7   :  { %v1881_v17 = vmul.f32 0.2, %v1849_v16  ;;  %v1331_v32 = vmul.f32 %v2270_v0, %v1315_v38  ;;  %v4042_v16 = vld [vmem:[#allocation33_spill] sm:$0xff]  ;;  %v4053_v0 = vld [vmem:[#allocation48_spill] sm:$0xff] }
 0x2a8   :  { %v1482_v29 = vpop.xlane.xlu0 %1481  ;;  %2281 = vpow2.f32 %v605_v47  ;;  %v629_v53 = vld [vmem:[#allocation3 + $0x20] sm:$0xff]  ;;  %v4054_v59 = vsub.f32 %v4053_v0, %v3295_v61  ;;  %v1532_v47 = vld [vmem:[#allocation7 + $0x38] sm:$0xff]  ;;  %v4056_v61 = vld [vmem:[#allocation51_spill] sm:$0xff] }
 0x2a9   :  { %v1897_v50 = vadd.f32 %v1881_v17, %v1865_v36  ;;  %v1503_v27 = vadd.f32 %v1482_v29, %v1327_v6  ;;  %2283 = vpow2.f32 %v601_v45  ;;  %v4043_v36 = vsub.f32 %v4042_v16, %v3213_v31  ;;  %v1534_v16 = vld [vmem:[#allocation7 + $0x48] sm:$0xff] }
 0x2aa   :  { %v2272_v62 = vpop.eup %2271  ;;  %v1291_v55 = vmul.f32 1.442695, %v4054_v59  ;;  %v1661_v60 = vld [vmem:[#allocation3 + $0x28] sm:$0xff]  ;;  %v1752_v59 = vld [vmem:[#allocation5] sm:$0xff] }
 0x2ab   :  { %v1929_v9 = vsel %vm1913_vm4, %v1897_v50, 0.0  ;;  %1519 = vst.msk [vmem:[#allocation6 + $0x50] sm:$0xff] %vm34_vm1, %v1503_v27  ;;  %v656_v2 = vmul.f32 %v2272_v62, %v640_v30  ;;  %v1283_v17 = vmul.f32 1.442695, %v4043_v36  ;;  %v4044_v50 = vld [vmem:[#allocation35_spill] sm:$0xff]  ;;  %v4045_v27 = vld [vmem:[#allocation36_spill] sm:$0xff] }
 0x2ac   :  { %1945 = vst.msk [vmem:[%s3866_s8 + $0x8] sm:$0xff] %vm34_vm1, %v1929_v9  ;;  %v808_v10 = vpop.xlane.xlu0 %807  ;;  %v4046_v21 = vsub.f32 %v4044_v50, %v4045_v27  ;;  %v4055_v30 = vld [vmem:[#allocation50_spill] sm:$0xff]  ;;  %v635_v27 = vld [vmem:[#allocation3 + $0x50] sm:$0xff] }
 0x2ad   :  { %v828_v58 = vadd.f32 %v808_v10, %v652_v12  ;;  %2285 = vpow2.f32 %v1283_v17 }
 0x2ae   :  { %v2274_v54 = vpop.eup %2273  ;;  %v613_v14 = vmul.f32 1.442695, %v4046_v21 }
 0x2af   :  { %845 = vst.msk [vmem:[#allocation3 + $0x58] sm:$0xff] %vm34_vm1, %v828_v58  ;;  %v2276_v18 = vpop.eup %2275  ;;  %v1329_v9 = vmul.f32 %v2274_v54, %v1313_v20 }
 0x2b0   :  { %v1478_v48 = vpop.xlane.xlu0 %1477  ;;  %v1317_v24 = vmul.f32 %v2276_v18, %v1301_v37  ;;  %v2278_v10 = vpop.eup %2277  ;;  %2287 = vpow2.f32 %v613_v14  ;;  %v1536_v14 = vld [vmem:[#allocation7 + $0x58] sm:$0xff] }
 0x2b1   :  { %v1501_v42 = vadd.f32 %v1478_v48, %v1325_v34  ;;  %v4049_v34 = vsub.f32 %v4047_v49, %v4048_v3  ;;  %v2280_v43 = vpop.eup %2279  ;;  %2289 = vlog2.f32 %v1656_v56  ;;  %v1320_v48 = vmul.f32 %v2278_v10, %v1304_v57  ;;  %v1306_v3 = vld [vmem:[#allocation6 + $0x28] sm:$0xff] }
 0x2b3   :  { %1517 = vst.msk [vmem:[#allocation6 + $0x40] sm:$0xff] %vm34_vm1, %v1501_v42  ;;  %v1279_v44 = vmul.f32 1.442695, %v4049_v34  ;;  %v638_v42 = vld [vmem:[#allocation3 + $0x68] sm:$0xff]  ;;  %v4060_v34 = vld [vmem:[#allocation55_spill] sm:$0xff] }
 0x2b5   :  { %v2282_v51 = vpop.eup %2281  ;;  %2291 = vpow2.f32 %v1279_v44  ;;  %v4061_v44 = vld [vmem:[#allocation56_spill] sm:$0xff] }
 0x2b6   :  { %2293 = vlog2.f32 %v1659_v15 }
 0x2b7   :  { %2295 = vpow2.f32 %v609_v40  ;;  %v633_v40 = vld [vmem:[#allocation3 + $0x40] sm:$0xff] }
 0x2b8   :  { %v804_v13 = vpop.xlane.xlu0 %803 }
 0x2b9   :  { %v826_v28 = vadd.f32 %v804_v13, %v650_v41  ;;  %v654_v41 = vmul.f32 %v2280_v43, %v638_v42  ;;  %v647_v13 = vmul.f32 %v2282_v51, %v631_v63  ;;  %v4062_v43 = vsub.f32 %v4060_v34, %v4061_v44  ;;  %v1640_v51 = vld [vmem:[#allocation2] sm:$0xff] }
 0x2bb   :  { %843 = vst.msk [vmem:[#allocation3 + $0x48] sm:$0xff] %vm34_vm1, %v826_v28  ;;  %v2284_v28 = vpop.eup %2283 }
 0x2bc   :  { %v645_v23 = vmul.f32 %v2284_v28, %v629_v53  ;;  %v2286_v39 = vpop.eup %2285  ;;  %v1720_v28 = vld [vmem:[#allocation4] sm:$0xff]  ;;  %v1540_v53 = vld [vmem:[#allocation7 + $0x78] sm:$0xff] }
 0x2bd   :  { %v2288_v17 = vpop.eup %2287 }
 0x2c0   :  { %v1490_v1 = vpop.xlane.xlu0 %1489 }
 0x2c1   :  { %v1507_v7 = vadd.f32 %v1490_v1, %v1331_v32  ;;  %v1772_v32 = vld [vmem:[#allocation6 + $0x20] sm:$0xff]  ;;  %v1308_v1 = vld [vmem:[#allocation6 + $0x38] sm:$0xff] }
 0x2c2   :  { %v1324_v18 = vmul.f32 %v2286_v39, %v1308_v1 }
 0x2c3   :  { %1523 = vst.msk [vmem:[#allocation6 + $0x70] sm:$0xff] %vm34_vm1, %v1507_v7  ;;  %v4057_v7 = vsub.f32 %v4055_v30, %v4056_v61  ;;  %v1312_v30 = vld [vmem:[#allocation6 + $0x58] sm:$0xff] }
 0x2c4   :  { %v816_v6 = vpop.xlane.xlu0 %815 }
 0x2c5   :  { %v832_v29 = vadd.f32 %v816_v6, %v656_v2  ;;  %v621_v2 = vmul.f32 1.442695, %v4057_v7  ;;  %v1663_v6 = vld [vmem:[#allocation3 + $0x38] sm:$0xff]  ;;  %v1832_v7 = vld [vmem:[#allocation7] sm:$0xff] }
 0x2c7   :  { %849 = vst.msk [vmem:[#allocation3 + $0x78] sm:$0xff] %vm34_vm1, %v832_v29  ;;  %v2290_v29 = vpop.eup %2289 }
 0x2c8   :  { %v1486_v12 = vpop.xlane.xlu0 %1485  ;;  %v2292_v10 = vpop.eup %2291  ;;  %v1673_v56 = vmul.f32 0.6931472, %v2290_v29 }
 0x2c9   :  { %v1505_v58 = vadd.f32 %v1486_v12, %v1329_v9  ;;  %v1462_v31 = vpop.xlane.xlu1 %1461  ;;  %v4058_v9 = vld [vmem:[#allocation53_spill] sm:$0xff]  ;;  %v2294_v57 = vpop.eup %2293  ;;  %v1322_v19 = vmul.f32 %v2292_v10, %v1306_v3 }
 0x2ca   :  { %v1493_v5 = vadd.f32 %v1462_v31, %v1317_v24  ;;  %v4059_v12 = vsub.f32 %v4058_v9, %v3324_v22  ;;  %v651_v31 = vmul.f32 %v2288_v17, %v635_v27  ;;  %v1538_v22 = vld [vmem:[#allocation7 + $0x68] sm:$0xff]  ;;  %v1704_v63 = vadd.f32 %v1673_v56, %v1640_v51 }
 0x2cb   :  { %1521 = vst.msk [vmem:[#allocation6 + $0x60] sm:$0xff] %vm34_vm1, %v1505_v58 }
 0x2cc   :  { %1509 = vst.msk [vmem:[#allocation6] sm:$0xff] %vm34_vm1, %v1493_v5  ;;  %v1287_v24 = vmul.f32 1.442695, %v4059_v12  ;;  %v1736_v39 = vsub.f32 %v1704_v63, %v1720_v28 }
 0x2cd   :  { %v1468_v26 = vpop.xlane.xlu1 %1467 }
 0x2ce   :  { %v1496_v46 = vadd.f32 %v1468_v26, %v1320_v48  ;;  %v617_v48 = vmul.f32 1.442695, %v4062_v43  ;;  %v2296_v26 = vpop.eup %2295  ;;  %v1864_v9 = vmul.f32 0.8, %v1736_v39  ;;  %v1724_v39 = vld [vmem:[#allocation4 + $0x20] sm:$0xff] }
 0x2d0   :  { %1512 = vst.msk [vmem:[#allocation6 + $0x18] sm:$0xff] %vm34_vm1, %v1496_v46  ;;  %v812_v11 = vpop.xlane.xlu0 %811  ;;  %v1679_v46 = vmul.f32 0.6931472, %v2294_v57  ;;  %v1835_v57 = vld [vmem:[#allocation7 + $0x18] sm:$0xff] }
 0x2d1   :  { %v830_v8 = vadd.f32 %v812_v11, %v654_v41  ;;  %v798_v4 = vpop.xlane.xlu1 %797 }
 0x2d2   :  { %v823_v35 = vadd.f32 %v798_v4, %v647_v13 }
 0x2d3   :  { %v1768_v38 = vld [vmem:[#allocation6] sm:$0xff]  ;;  %847 = vst.msk [vmem:[#allocation3 + $0x68] sm:$0xff] %vm34_vm1, %v830_v8 }
 0x2d4   :  { %2297 = vlog2.f32 %v1768_v38  ;;  %840 = vst.msk [vmem:[#allocation3 + $0x30] sm:$0xff] %vm34_vm1, %v823_v35  ;;  %v1572_v62 = vpop.xlane.xlu0 %1571  ;;  %v4063_v35 = vld [vmem:[#allocation60_spill] sm:$0xff] }
 0x2d5   :  { %v1596_v52 = vadd.f32 %v1572_v62, %v1532_v47  ;;  %v794_v45 = vpop.xlane.xlu1 %793  ;;  %2299 = vpow2.f32 %v1291_v55  ;;  %v1643_v55 = vld [vmem:[#allocation2 + $0x18] sm:$0xff]  ;;  %v4064_v47 = vsub.f32 %v4063_v35, %v3377_v25  ;;  %v649_v62 = vmul.f32 %v2296_v26, %v633_v40  ;;  %v4065_v25 = vld [vmem:[#allocation62_spill] sm:$0xff] }
 0x2d6   :  { %v821_v54 = vadd.f32 %v794_v45, %v645_v23  ;;  %2301 = vlog2.f32 %v1772_v32  ;;  %v1647_v40 = vld [vmem:[#allocation2 + $0x38] sm:$0xff]  ;;  %v1665_v35 = vld [vmem:[#allocation3 + $0x48] sm:$0xff] }
 0x2d7   :  { %v1771_v36 = vld [vmem:[#allocation6 + $0x18] sm:$0xff]  ;;  %1612 = vst.msk [vmem:[#allocation7 + $0x38] sm:$0xff] %vm34_vm1, %v1596_v52  ;;  %v1299_v38 = vmul.f32 1.442695, %v4064_v47  ;;  %v1707_v52 = vadd.f32 %v1679_v46, %v1643_v55 }
 0x2d8   :  { %2303 = vlog2.f32 %v1771_v36  ;;  %838 = vst.msk [vmem:[#allocation3 + $0x20] sm:$0xff] %vm34_vm1, %v821_v54  ;;  %v1576_v20 = vpop.xlane.xlu0 %1575 }
 0x2d9   :  { %v1598_v37 = vadd.f32 %v1576_v20, %v1534_v16  ;;  %v1476_v50 = vpop.xlane.xlu1 %1475  ;;  %2305 = vpow2.f32 %v621_v2  ;;  %v4066_v16 = vld [vmem:[#allocation64_spill] sm:$0xff] }
 0x2da   :  { %v1500_v21 = vadd.f32 %v1476_v50, %v1324_v18  ;;  %2307 = vlog2.f32 %v1663_v6  ;;  %v4067_v36 = vsub.f32 %v4065_v25, %v4066_v16  ;;  %v1755_v50 = vld [vmem:[#allocation5 + $0x18] sm:$0xff] }
 0x2db   :  { %1614 = vst.msk [vmem:[#allocation7 + $0x48] sm:$0xff] %vm34_vm1, %v1598_v37  ;;  %2309 = vpow2.f32 %v1287_v24  ;;  %v1723_v37 = vld [vmem:[#allocation4 + $0x18] sm:$0xff] }
 0x2dc   :  { %1516 = vst.msk [vmem:[#allocation6 + $0x38] sm:$0xff] %vm34_vm1, %v1500_v21  ;;  %v1580_v58 = vpop.xlane.xlu0 %1579  ;;  %v1295_v17 = vmul.f32 1.442695, %v4067_v36  ;;  %v1739_v12 = vsub.f32 %v1707_v52, %v1723_v37  ;;  %v1667_v24 = vld [vmem:[#allocation3 + $0x58] sm:$0xff] }
 0x2dd   :  { %v1600_v5 = vadd.f32 %v1580_v58, %v1536_v14  ;;  %v806_v49 = vpop.xlane.xlu1 %805  ;;  %v639_v58 = vld [vmem:[#allocation3 + $0x70] sm:$0xff]  ;;  %v1316_v37 = vld [vmem:[#allocation6 + $0x78] sm:$0xff] }
 0x2de   :  { %v827_v42 = vadd.f32 %v806_v49, %v651_v31  ;;  %v2363_v31 = vld [vmem:[%s3862_s6] sm:$0xff] }
 0x2df   :  { %v1660_v15 = vld [vmem:[#allocation3 + $0x20] sm:$0xff]  ;;  %1616 = vst.msk [vmem:[#allocation7 + $0x58] sm:$0xff] %vm34_vm1, %v1600_v5  ;;  %vm1912_vm5 = vcmp.ge.s32.totalorder %v2363_v31, 0 }
 0x2e0   :  { %2311 = vlog2.f32 %v1660_v15  ;;  %844 = vst.msk [vmem:[#allocation3 + $0x50] sm:$0xff] %vm34_vm1, %v827_v42  ;;  %v1584_v33 = vpop.xlane.xlu0 %1583  ;;  %v1756_v49 = vld [vmem:[#allocation5 + $0x20] sm:$0xff]  ;;  %v1867_v15 = vmul.f32 0.8, %v1739_v12 }
 0x2e1   :  { %v2298_v41 = vpop.eup %2297  ;;  %v1602_v11 = vadd.f32 %v1584_v33, %v1538_v22  ;;  %v1472_v13 = vpop.xlane.xlu1 %1471  ;;  %2313 = vpow2.f32 %v617_v48 }
 0x2e2   :  { %v1785_v8 = vmul.f32 0.6931472, %v2298_v41  ;;  %v1498_v4 = vadd.f32 %v1472_v13, %v1322_v19  ;;  %v2300_v0 = vpop.eup %2299  ;;  %2315 = vlog2.f32 %v1661_v60  ;;  %v2364_v60 = vld [vmem:[%s3862_s6 + $0x18] sm:$0xff]  ;;  %v1310_v19 = vld [vmem:[#allocation6 + $0x48] sm:$0xff]  ;;  %v1836_v41 = vld [vmem:[#allocation7 + $0x20] sm:$0xff] }
 0x2e3   :  { %v1775_v32 = vld [vmem:[#allocation6 + $0x38] sm:$0xff]  ;;  %1618 = vst.msk [vmem:[#allocation7 + $0x68] sm:$0xff] %vm34_vm1, %v1602_v11  ;;  %v2302_v23 = vpop.eup %2301  ;;  %v1328_v21 = vmul.f32 %v2300_v0, %v1312_v30  ;;  %vm1915_vm6 = vcmp.ge.s32.totalorder %v2364_v60, 0  ;;  %v1662_v13 = vld [vmem:[#allocation3 + $0x30] sm:$0xff]  ;;  %v1725_v60 = vld [vmem:[#allocation4 + $0x28] sm:$0xff] }
 0x2e4   :  { %v1816_v45 = vadd.f32 %v1785_v8, %v1752_v59  ;;  %2317 = vlog2.f32 %v1775_v32  ;;  %1514 = vst.msk [vmem:[#allocation6 + $0x28] sm:$0xff] %vm34_vm1, %v1498_v4  ;;  %v1588_v1 = vpop.xlane.xlu0 %1587  ;;  %v1793_v27 = vmul.f32 0.6931472, %v2302_v23 }
 0x2e5   :  { %v2304_v61 = vpop.eup %2303  ;;  %v1604_v2 = vadd.f32 %v1588_v1, %v1540_v53  ;;  %v802_v54 = vpop.xlane.xlu1 %801  ;;  %2319 = vpow2.f32 %v1299_v38  ;;  %v1644_v53 = vld [vmem:[#allocation2 + $0x20] sm:$0xff] }
 0x2e6   :  { %v1848_v6 = vsub.f32 %v1816_v45, %v1832_v7  ;;  %v1791_v20 = vmul.f32 0.6931472, %v2304_v61  ;;  %v825_v18 = vadd.f32 %v802_v54, %v649_v62  ;;  %v2306_v29 = vpop.eup %2305  ;;  %2321 = vpow2.f32 %v1295_v17  ;;  %v637_v62 = vld [vmem:[#allocation3 + $0x60] sm:$0xff]  ;;  %v1727_v45 = vld [vmem:[#allocation4 + $0x38] sm:$0xff]  ;;  %v1774_v54 = vld [vmem:[#allocation6 + $0x30] sm:$0xff] }
 0x2e7   :  { %1620 = vst.msk [vmem:[#allocation7 + $0x78] sm:$0xff] %vm34_vm1, %v1604_v2  ;;  %v2308_v14 = vpop.eup %2307  ;;  %v1820_v48 = vadd.f32 %v1793_v27, %v1756_v49  ;;  %2323 = vlog2.f32 %v1667_v24  ;;  %v655_v22 = vmul.f32 %v2306_v29, %v639_v58  ;;  %v1759_v2 = vld [vmem:[#allocation5 + $0x38] sm:$0xff]  ;;  %v1776_v27 = vld [vmem:[#allocation6 + $0x40] sm:$0xff]  ;;  %v1666_v24 = vld [vmem:[#allocation3 + $0x50] sm:$0xff] }
 0x2e8   :  { %v1880_v10 = vmul.f32 0.2, %v1848_v6  ;;  %v1819_v56 = vadd.f32 %v1791_v20, %v1755_v50  ;;  %842 = vst.msk [vmem:[#allocation3 + $0x40] sm:$0xff] %vm34_vm1, %v825_v18  ;;  %v1687_v43 = vmul.f32 0.6931472, %v2308_v14  ;;  %v2310_v51 = vpop.eup %2309  ;;  %v2365_v50 = vld [vmem:[%s3862_s6 + $0x20] sm:$0xff] }
 0x2e9   :  { %v1484_v5 = vpop.xlane.xlu1 %1483  ;;  %v1852_v59 = vsub.f32 %v1820_v48, %v1836_v41  ;;  %v1326_v32 = vmul.f32 %v2310_v51, %v1310_v19  ;;  %vm1916_vm7 = vcmp.ge.s32.totalorder %v2365_v50, 0  ;;  %v1645_v58 = vld [vmem:[#allocation2 + $0x28] sm:$0xff]  ;;  %v1782_v50 = vld [vmem:[#allocation6 + $0x70] sm:$0xff] }
 0x2ea   :  { %v1896_v3 = vadd.f32 %v1880_v10, %v1864_v9  ;;  %v1851_v34 = vsub.f32 %v1819_v56, %v1835_v57  ;;  %v1504_v44 = vadd.f32 %v1484_v5, %v1328_v21  ;;  %v1711_v0 = vadd.f32 %v1687_v43, %v1647_v40  ;;  %v1839_v21 = vld [vmem:[#allocation7 + $0x38] sm:$0xff]  ;;  %v1778_v57 = vld [vmem:[#allocation6 + $0x50] sm:$0xff]  ;;  %v1314_v48 = vld [vmem:[#allocation6 + $0x68] sm:$0xff] }
 0x2eb   :  { %v1773_v42 = vld [vmem:[#allocation6 + $0x28] sm:$0xff]  ;;  %v1884_v16 = vmul.f32 0.2, %v1852_v59  ;;  %v1780_v59 = vld [vmem:[#allocation6 + $0x60] sm:$0xff] }
 0x2ec   :  { %v1928_v26 = vsel %vm1912_vm5, %v1896_v3, 0.0  ;;  %v1883_v63 = vmul.f32 0.2, %v1851_v34  ;;  %2325 = vlog2.f32 %v1773_v42  ;;  %1520 = vst.msk [vmem:[#allocation6 + $0x58] sm:$0xff] %vm34_vm1, %v1504_v44  ;;  %v1743_v25 = vsub.f32 %v1711_v0, %v1727_v45  ;;  %v1671_v34 = vld [vmem:[#allocation3 + $0x78] sm:$0xff] }
 0x2ed   :  { %v2312_v46 = vpop.eup %2311  ;;  %1944 = vst.msk [vmem:[%s3866_s8] sm:$0xff] %vm34_vm1, %v1928_v26  ;;  %v814_v33 = vpop.xlane.xlu1 %813  ;;  %2327 = vlog2.f32 %v1662_v13  ;;  %v1651_v0 = vld [vmem:[#allocation2 + $0x58] sm:$0xff] }
 0x2ee   :  { %v1899_v11 = vadd.f32 %v1883_v63, %v1867_v15  ;;  %v1681_v28 = vmul.f32 0.6931472, %v2312_v46  ;;  %v831_v8 = vadd.f32 %v814_v33, %v655_v22  ;;  %v2314_v4 = vpop.eup %2313  ;;  %2329 = vlog2.f32 %v1665_v35  ;;  %v2366_v22 = vld [vmem:[%s3862_s6 + $0x38] sm:$0xff]  ;;  %v1757_v46 = vld [vmem:[#allocation5 + $0x28] sm:$0xff] }
 0x2ef   :  { %v2316_v55 = vpop.eup %2315  ;;  %v1664_v61 = vld [vmem:[#allocation3 + $0x40] sm:$0xff]  ;;  %v653_v17 = vmul.f32 %v2314_v4, %v637_v62  ;;  %v1871_v31 = vmul.f32 0.8, %v1743_v25  ;;  %vm1919_vm8 = vcmp.ge.s32.totalorder %v2366_v22, 0 }
 0x2f0   :  { %v1931_v47 = vsel %vm1915_vm6, %v1899_v11, 0.0  ;;  %v1708_v38 = vadd.f32 %v1681_v28, %v1644_v53  ;;  %848 = vst.msk [vmem:[#allocation3 + $0x70] sm:$0xff] %vm34_vm1, %v831_v8  ;;  %v1683_v20 = vmul.f32 0.6931472, %v2316_v55  ;;  %v1669_v11 = vld [vmem:[#allocation3 + $0x68] sm:$0xff]  ;;  %v1648_v22 = vld [vmem:[#allocation2 + $0x40] sm:$0xff] }
 0x2f1   :  { %v2318_v23 = vpop.eup %2317  ;;  %1947 = vst.msk [vmem:[%s3866_s8 + $0x18] sm:$0xff] %vm34_vm1, %v1931_v47  ;;  %v1480_v52 = vpop.xlane.xlu1 %1479  ;;  %v1837_v8 = vld [vmem:[#allocation7 + $0x28] sm:$0xff] }
 0x2f2   :  { %v1740_v1 = vsub.f32 %v1708_v38, %v1724_v39  ;;  %v1799_v30 = vmul.f32 0.6931472, %v2318_v23  ;;  %v1502_v7 = vadd.f32 %v1480_v52, %v1326_v32  ;;  %v2320_v6 = vpop.eup %2319  ;;  %v1709_v3 = vadd.f32 %v1683_v20, %v1645_v58  ;;  %v1531_v32 = vld [vmem:[#allocation7 + $0x30] sm:$0xff] }
 0x2f3   :  { %v1779_v36 = vld [vmem:[#allocation6 + $0x58] sm:$0xff]  ;;  %v2322_v56 = vpop.eup %2321  ;;  %v1332_v5 = vmul.f32 %v2320_v6, %v1316_v37 }
 0x2f4   :  { %v1868_v18 = vmul.f32 0.8, %v1740_v1  ;;  %v1823_v29 = vadd.f32 %v1799_v30, %v1759_v2  ;;  %2331 = vlog2.f32 %v1779_v36  ;;  %1518 = vst.msk [vmem:[#allocation6 + $0x48] sm:$0xff] %vm34_vm1, %v1502_v7  ;;  %v2324_v49 = vpop.eup %2323  ;;  %v1330_v40 = vmul.f32 %v2322_v56, %v1314_v48  ;;  %v2367_v1 = vld [vmem:[%s3862_s6 + $0x28] sm:$0xff]  ;;  %v1731_v2 = vld [vmem:[#allocation4 + $0x58] sm:$0xff] }
 0x2f5   :  { %2333 = vlog2.f32 %v1664_v61  ;;  %v810_v14 = vpop.xlane.xlu1 %809  ;;  %v1695_v33 = vmul.f32 0.6931472, %v2324_v49  ;;  %v1741_v41 = vsub.f32 %v1709_v3, %v1725_v60  ;;  %vm1917_vm9 = vcmp.ge.s32.totalorder %v2367_v1, 0  ;;  %v3781_v49 = vld [vmem:[%s3862_s6 + $0x30] sm:$0xff]  ;;  %v2369_v3 = vld [vmem:[%s3862_s6 + $0x58] sm:$0xff] }
 0x2f6   :  { %2335 = vlog2.f32 %v1774_v54  ;;  %v1900_v9 = vadd.f32 %v1884_v16, %v1868_v18  ;;  %v1855_v12 = vsub.f32 %v1823_v29, %v1839_v21  ;;  %v829_v10 = vadd.f32 %v810_v14, %v653_v17  ;;  %v1763_v17 = vld [vmem:[#allocation5 + $0x58] sm:$0xff]  ;;  %v1533_v18 = vld [vmem:[#allocation7 + $0x40] sm:$0xff]  ;;  %v1646_v29 = vld [vmem:[#allocation2 + $0x30] sm:$0xff] }
 0x2f7   :  { %2337 = vlog2.f32 %v1776_v27  ;;  %v1715_v47 = vadd.f32 %v1695_v33, %v1651_v0  ;;  %v1869_v23 = vmul.f32 0.8, %v1741_v41  ;;  %v1670_v52 = vld [vmem:[#allocation3 + $0x70] sm:$0xff]  ;;  %vm1918_vm10 = vcmp.ge.s32.totalorder %v3781_v49, 0 }
 0x2f8   :  { %v1932_v44 = vsel %vm1916_vm7, %v1900_v9, 0.0  ;;  %v1887_v43 = vmul.f32 0.2, %v1855_v12  ;;  %846 = vst.msk [vmem:[#allocation3 + $0x60] sm:$0xff] %vm34_vm1, %v829_v10  ;;  %2339 = vlog2.f32 %v1666_v24  ;;  %v1843_v12 = vld [vmem:[#allocation7 + $0x58] sm:$0xff]  ;;  %vm1923_vm11 = vcmp.ge.s32.totalorder %v2369_v3, 0 }
 0x2f9   :  { %v2326_v42 = vpop.eup %2325  ;;  %1948 = vst.msk [vmem:[%s3866_s8 + $0x20] sm:$0xff] %vm34_vm1, %v1932_v44  ;;  %v1492_v51 = vpop.xlane.xlu1 %1491  ;;  %2341 = vlog2.f32 %v1778_v57  ;;  %v1747_v6 = vsub.f32 %v1715_v47, %v1731_v2  ;;  %v1758_v60 = vld [vmem:[#allocation5 + $0x30] sm:$0xff]  ;;  %v1537_v47 = vld [vmem:[#allocation7 + $0x60] sm:$0xff] }
 0x2fa   :  { %v1903_v15 = vadd.f32 %v1887_v43, %v1871_v31  ;;  %v1795_v26 = vmul.f32 0.6931472, %v2326_v42  ;;  %v1508_v63 = vadd.f32 %v1492_v51, %v1332_v5  ;;  %2343 = vlog2.f32 %v1671_v34  ;;  %v2328_v53 = vpop.eup %2327  ;;  %v1649_v34 = vld [vmem:[#allocation2 + $0x48] sm:$0xff]  ;;  %v1535_v43 = vld [vmem:[#allocation7 + $0x50] sm:$0xff] }
 0x2fb   :  { %v1777_v19 = vld [vmem:[#allocation6 + $0x48] sm:$0xff]  ;;  %v2330_v62 = vpop.eup %2329  ;;  %v1685_v30 = vmul.f32 0.6931472, %v2328_v53  ;;  %v1726_v42 = vld [vmem:[#allocation4 + $0x30] sm:$0xff]  ;;  %v1875_v51 = vmul.f32 0.8, %v1747_v6 }
 0x2fc   :  { %v1935_v13 = vsel %vm1919_vm8, %v1903_v15, 0.0  ;;  %v1821_v28 = vadd.f32 %v1795_v26, %v1757_v46  ;;  %2345 = vlog2.f32 %v1777_v19  ;;  %1524 = vst.msk [vmem:[#allocation6 + $0x78] sm:$0xff] %vm34_vm1, %v1508_v63  ;;  %v1691_v37 = vmul.f32 0.6931472, %v2330_v62  ;;  %v3791_v46 = vld [vmem:[%s3862_s6 + $0x48] sm:$0xff]  ;;  %v1728_v62 = vld [vmem:[#allocation4 + $0x40] sm:$0xff] }
 0x2fd   :  { %1951 = vst.msk [vmem:[%s3866_s8 + $0x38] sm:$0xff] %vm34_vm1, %v1935_v13  ;;  %v1488_v4 = vpop.xlane.xlu1 %1487  ;;  %2347 = vlog2.f32 %v1669_v11  ;;  %v1710_v9 = vadd.f32 %v1685_v30, %v1646_v29  ;;  %vm1921_vm12 = vcmp.ge.s32.totalorder %v3791_v46, 0  ;;  %v1761_v13 = vld [vmem:[#allocation5 + $0x48] sm:$0xff]  ;;  %v1655_v6 = vld [vmem:[#allocation2 + $0x78] sm:$0xff] }
 0x2fe   :  { %v1853_v55 = vsub.f32 %v1821_v28, %v1837_v8  ;;  %v1506_v35 = vadd.f32 %v1488_v4, %v1330_v40  ;;  %v1713_v15 = vadd.f32 %v1691_v37, %v1649_v34  ;;  %v1729_v28 = vld [vmem:[#allocation4 + $0x48] sm:$0xff]  ;;  %v1735_v34 = vld [vmem:[#allocation4 + $0x78] sm:$0xff] }
 0x2ff   :  { %v1668_v38 = vld [vmem:[#allocation3 + $0x60] sm:$0xff]  ;;  %v1742_v40 = vsub.f32 %v1710_v9, %v1726_v42 }
 0x300   :  { %v1885_v39 = vmul.f32 0.2, %v1853_v55  ;;  %2349 = vlog2.f32 %v1668_v38  ;;  %1522 = vst.msk [vmem:[#allocation6 + $0x68] sm:$0xff] %vm34_vm1, %v1506_v35 }
 0x301   :  { %v2332_v45 = vpop.eup %2331  ;;  %2351 = vlog2.f32 %v1780_v59  ;;  %v1570_v61 = vpop.xlane.xlu1 %1569  ;;  %v1870_v2 = vmul.f32 0.8, %v1742_v40 }
 0x302   :  { %v2334_v7 = vpop.eup %2333  ;;  %v1901_v54 = vadd.f32 %v1885_v39, %v1869_v23  ;;  %v1807_v25 = vmul.f32 0.6931472, %v2332_v45  ;;  %v1595_v16 = vadd.f32 %v1570_v61, %v1531_v32  ;;  %2353 = vlog2.f32 %v1670_v52  ;;  %v1650_v32 = vld [vmem:[#allocation2 + $0x50] sm:$0xff]  ;;  %v1760_v23 = vld [vmem:[#allocation5 + $0x40] sm:$0xff]  ;;  %v1841_v61 = vld [vmem:[#allocation7 + $0x48] sm:$0xff] }
 0x303   :  { %v2336_v36 = vpop.eup %2335  ;;  %v1783_v20 = vld [vmem:[#allocation6 + $0x78] sm:$0xff]  ;;  %v1689_v24 = vmul.f32 0.6931472, %v2334_v7  ;;  %v1745_v39 = vsub.f32 %v1713_v15, %v1729_v28 }
 0x304   :  { %v1933_v27 = vsel %vm1917_vm9, %v1901_v54, 0.0  ;;  %v1827_v21 = vadd.f32 %v1807_v25, %v1763_v17  ;;  %2355 = vlog2.f32 %v1783_v20  ;;  %1611 = vst.msk [vmem:[#allocation7 + $0x30] sm:$0xff] %vm34_vm1, %v1595_v16  ;;  %v2338_v14 = vpop.eup %2337  ;;  %v1797_v31 = vmul.f32 0.6931472, %v2336_v36  ;;  %v1762_v17 = vld [vmem:[#allocation5 + $0x50] sm:$0xff] }
 0x305   :  { %1949 = vst.msk [vmem:[%s3866_s8 + $0x28] sm:$0xff] %vm34_vm1, %v1933_v27  ;;  %v1574_v10 = vpop.xlane.xlu1 %1573  ;;  %v2340_v56 = vpop.eup %2339  ;;  %2357 = vlog2.f32 %v1782_v50  ;;  %v1712_v19 = vadd.f32 %v1689_v24, %v1648_v22  ;;  %v1801_v41 = vmul.f32 0.6931472, %v2338_v14  ;;  %v2371_v50 = vld [vmem:[%s3862_s6 + $0x40] sm:$0xff]  ;;  %v1730_v27 = vld [vmem:[#allocation4 + $0x50] sm:$0xff] }
 0x306   :  { %v1859_v58 = vsub.f32 %v1827_v21, %v1843_v12  ;;  %v1597_v57 = vadd.f32 %v1574_v10, %v1533_v18  ;;  %v2342_v5 = vpop.eup %2341  ;;  %v1693_v33 = vmul.f32 0.6931472, %v2340_v56  ;;  %v1822_v53 = vadd.f32 %v1797_v31, %v1758_v60  ;;  %v1652_v10 = vld [vmem:[#allocation2 + $0x60] sm:$0xff] }
 0x307   :  { %v1781_v44 = vld [vmem:[#allocation6 + $0x68] sm:$0xff]  ;;  %v2344_v48 = vpop.eup %2343  ;;  %v1805_v35 = vmul.f32 0.6931472, %v2342_v5  ;;  %v1744_v54 = vsub.f32 %v1712_v19, %v1728_v62  ;;  %v1824_v25 = vadd.f32 %v1801_v41, %v1760_v23  ;;  %vm1920_vm13 = vcmp.ge.s32.totalorder %v2371_v50, 0  ;;  %v1539_v5 = vld [vmem:[#allocation7 + $0x70] sm:$0xff] }
 0x308   :  { %v1891_v26 = vmul.f32 0.2, %v1859_v58  ;;  %2359 = vlog2.f32 %v1781_v44  ;;  %1613 = vst.msk [vmem:[#allocation7 + $0x40] sm:$0xff] %vm34_vm1, %v1597_v57  ;;  %v1703_v59 = vmul.f32 0.6931472, %v2344_v48  ;;  %v1714_v7 = vadd.f32 %v1693_v33, %v1650_v32  ;;  %v1767_v33 = vld [vmem:[#allocation5 + $0x78] sm:$0xff] }
 0x309   :  { %v2346_v63 = vpop.eup %2345  ;;  %v1578_v11 = vpop.xlane.xlu1 %1577  ;;  %v1826_v12 = vadd.f32 %v1805_v35, %v1762_v17  ;;  %v1873_v56 = vmul.f32 0.8, %v1745_v39  ;;  %v2372_v35 = vld [vmem:[%s3862_s6 + $0x50] sm:$0xff]  ;;  %v1733_v23 = vld [vmem:[#allocation4 + $0x68] sm:$0xff] }
 0x30a   :  { %v1907_v8 = vadd.f32 %v1891_v26, %v1875_v51  ;;  %v1803_v4 = vmul.f32 0.6931472, %v2346_v63  ;;  %v1599_v0 = vadd.f32 %v1578_v11, %v1535_v43  ;;  %v2348_v38 = vpop.eup %2347  ;;  %v1719_v21 = vadd.f32 %v1703_v59, %v1655_v6  ;;  %v1653_v51 = vld [vmem:[#allocation2 + $0x68] sm:$0xff]  ;;  %v1766_v50 = vld [vmem:[#allocation5 + $0x70] sm:$0xff] }
 0x30b   :  { %v1838_v55 = vld [vmem:[#allocation7 + $0x30] sm:$0xff]  ;;  %v1699_v14 = vmul.f32 0.6931472, %v2348_v38  ;;  %v1872_v43 = vmul.f32 0.8, %v1744_v54  ;;  %v1746_v48 = vsub.f32 %v1714_v7, %v1730_v27  ;;  %vm1922_vm14 = vcmp.ge.s32.totalorder %v2372_v35, 0 }
 0x30c   :  { %v1939_v52 = vsel %vm1923_vm11, %v1907_v8, 0.0  ;;  %v1825_v45 = vadd.f32 %v1803_v4, %v1761_v13  ;;  %v1854_v1 = vsub.f32 %v1822_v53, %v1838_v55  ;;  %1615 = vst.msk [vmem:[#allocation7 + $0x50] sm:$0xff] %vm34_vm1, %v1599_v0  ;;  %v1751_v19 = vsub.f32 %v1719_v21, %v1735_v34  ;;  %v1732_v8 = vld [vmem:[#allocation4 + $0x60] sm:$0xff]  ;;  %v1847_v38 = vld [vmem:[#allocation7 + $0x78] sm:$0xff] }
 0x30d   :  { %v2350_v30 = vpop.eup %2349  ;;  %1955 = vst.msk [vmem:[%s3866_s8 + $0x58] sm:$0xff] %vm34_vm1, %v1939_v52  ;;  %v1582_v16 = vpop.xlane.xlu1 %1581  ;;  %v1717_v40 = vadd.f32 %v1699_v14, %v1653_v51  ;;  %v1764_v4 = vld [vmem:[#allocation5 + $0x60] sm:$0xff]  ;;  %v1874_v32 = vmul.f32 0.8, %v1746_v48 }
 0x30e   :  { %v2352_v36 = vpop.eup %2351  ;;  %v1857_v20 = vsub.f32 %v1825_v45, %v1841_v61  ;;  %v1697_v18 = vmul.f32 0.6931472, %v2350_v30  ;;  %v1886_v29 = vmul.f32 0.2, %v1854_v1  ;;  %v1601_v37 = vadd.f32 %v1582_v16, %v1537_v47  ;;  %v1654_v47 = vld [vmem:[#allocation2 + $0x70] sm:$0xff]  ;;  %v1765_v30 = vld [vmem:[#allocation5 + $0x68] sm:$0xff] }
 0x30f   :  { %v1840_v9 = vld [vmem:[#allocation7 + $0x40] sm:$0xff]  ;;  %v2354_v24 = vpop.eup %2353  ;;  %v1809_v42 = vmul.f32 0.6931472, %v2352_v36  ;;  %v1879_v61 = vmul.f32 0.8, %v1751_v19  ;;  %v1749_v7 = vsub.f32 %v1717_v40, %v1733_v23 }
 0x310   :  { %v1889_v58 = vmul.f32 0.2, %v1857_v20  ;;  %v1902_v31 = vadd.f32 %v1886_v29, %v1870_v2  ;;  %v1856_v57 = vsub.f32 %v1824_v25, %v1840_v9  ;;  %1617 = vst.msk [vmem:[#allocation7 + $0x60] sm:$0xff] %vm34_vm1, %v1601_v37  ;;  %v1716_v44 = vadd.f32 %v1697_v18, %v1652_v10  ;;  %v2373_v20 = vld [vmem:[%s3862_s6 + $0x78] sm:$0xff]  ;;  %v1845_v18 = vld [vmem:[#allocation7 + $0x68] sm:$0xff]  ;;  %v1734_v37 = vld [vmem:[#allocation4 + $0x70] sm:$0xff] }
 0x311   :  { %v2356_v3 = vpop.eup %2355  ;;  %v1586_v22 = vpop.xlane.xlu1 %1585  ;;  %v1701_v41 = vmul.f32 0.6931472, %v2354_v24  ;;  %v1828_v46 = vadd.f32 %v1809_v42, %v1764_v4  ;;  %vm1927_vm15 = vcmp.ge.s32.totalorder %v2373_v20, 0 }
 0x312   :  { %v1905_v15 = vadd.f32 %v1889_v58, %v1873_v56  ;;  %v1815_v26 = vmul.f32 0.6931472, %v2356_v3  ;;  %v1934_v63 = vsel %vm1918_vm10, %v1902_v31, 0.0  ;;  %v1888_v60 = vmul.f32 0.2, %v1856_v57  ;;  %v2358_v28 = vpop.eup %2357  ;;  %v2375_v3 = vld [vmem:[%s3862_s6 + $0x68] sm:$0xff] }
 0x313   :  { %1950 = vst.msk [vmem:[%s3866_s8 + $0x30] sm:$0xff] %vm34_vm1, %v1934_v63  ;;  %v1842_v11 = vld [vmem:[#allocation7 + $0x50] sm:$0xff]  ;;  %v1603_v13 = vadd.f32 %v1586_v22, %v1539_v5  ;;  %v1748_v62 = vsub.f32 %v1716_v44, %v1732_v8  ;;  %v1718_v2 = vadd.f32 %v1701_v41, %v1654_v47  ;;  %v1813_v25 = vmul.f32 0.6931472, %v2358_v28 }
 0x314   :  { %v1937_v53 = vsel %vm1921_vm12, %v1905_v15, 0.0  ;;  %v1831_v49 = vadd.f32 %v1815_v26, %v1767_v33  ;;  %v1904_v0 = vadd.f32 %v1888_v60, %v1872_v43  ;;  %v1858_v59 = vsub.f32 %v1826_v12, %v1842_v11  ;;  %v2374_v12 = vld [vmem:[%s3862_s6 + $0x60] sm:$0xff]  ;;  %v2376_v22 = vld [vmem:[%s3862_s6 + $0x70] sm:$0xff] }
 0x315   :  { %v2360_v55 = vpop.eup %2359  ;;  %1953 = vst.msk [vmem:[%s3866_s8 + $0x48] sm:$0xff] %vm34_vm1, %v1937_v53  ;;  %1619 = vst.msk [vmem:[#allocation7 + $0x70] sm:$0xff] %vm34_vm1, %v1603_v13  ;;  %v1876_v29 = vmul.f32 0.8, %v1748_v62  ;;  %vm1924_vm0 = vcmp.ge.s32.totalorder %v2374_v12, 0  ;;  %v1750_v24 = vsub.f32 %v1718_v2, %v1734_v37  ;;  %v1830_v10 = vadd.f32 %v1813_v25, %v1766_v50 }
 0x316   :  { %v1863_v39 = vsub.f32 %v1831_v49, %v1847_v38  ;;  %v1811_v52 = vmul.f32 0.6931472, %v2360_v55  ;;  %v1936_v45 = vsel %vm1920_vm13, %v1904_v0, 0.0  ;;  %v1890_v1 = vmul.f32 0.2, %v1858_v59 }
 0x317   :  { %1952 = vst.msk [vmem:[%s3866_s8 + $0x40] sm:$0xff] %vm34_vm1, %v1936_v45  ;;  %v1844_v54 = vld [vmem:[#allocation7 + $0x60] sm:$0xff]  ;;  %v1877_v56 = vmul.f32 0.8, %v1749_v7  ;;  %vm1925_vm3 = vcmp.ge.s32.totalorder %v2375_v3, 0  ;;  %vm1926_vm2 = vcmp.ge.s32.totalorder %v2376_v22, 0 }
 0x318   :  { %v1895_v16 = vmul.f32 0.2, %v1863_v39  ;;  %v1829_v36 = vadd.f32 %v1811_v52, %v1765_v30  ;;  %v1906_v17 = vadd.f32 %v1890_v1, %v1874_v32  ;;  %v1860_v6 = vsub.f32 %v1828_v46, %v1844_v54 }
 0x319   :  { %v1878_v48 = vmul.f32 0.8, %v1750_v24 }
 0x31a   :  { %v1911_v27 = vadd.f32 %v1895_v16, %v1879_v61  ;;  %v1861_v21 = vsub.f32 %v1829_v36, %v1845_v18  ;;  %v1938_v14 = vsel %vm1922_vm14, %v1906_v17, 0.0  ;;  %v1892_v9 = vmul.f32 0.2, %v1860_v6 }
 0x31b   :  { %1954 = vst.msk [vmem:[%s3866_s8 + $0x50] sm:$0xff] %vm34_vm1, %v1938_v14 }
 0x31c   :  { %v1943_v58 = vsel %vm1927_vm15, %v1911_v27, 0.0  ;;  %v1893_v31 = vmul.f32 0.2, %v1861_v21  ;;  %v1908_v57 = vadd.f32 %v1892_v9, %v1876_v29  ;;  %v1846_v5 = vld [vmem:[#allocation7 + $0x70] sm:$0xff] }
 0x31d   :  { %1959 = vst.msk [vmem:[%s3866_s8 + $0x78] sm:$0xff] %vm34_vm1, %v1943_v58  ;;  %v1862_v34 = vsub.f32 %v1830_v10, %v1846_v5 }
 0x31e   :  { %v1909_v44 = vadd.f32 %v1893_v31, %v1877_v56  ;;  %v1940_v43 = vsel %vm1924_vm0, %v1908_v57, 0.0 }
 0x31f   :  { %1956 = vst.msk [vmem:[%s3866_s8 + $0x60] sm:$0xff] %vm34_vm1, %v1940_v43  ;;  %v1894_v42 = vmul.f32 0.2, %v1862_v34 }
 0x320   :  { %v1941_v51 = vsel %vm1925_vm3, %v1909_v44, 0.0 }
 0x321   :  { %1957 = vst.msk [vmem:[%s3866_s8 + $0x68] sm:$0xff] %vm34_vm1, %v1941_v51  ;;  %v1910_v15 = vadd.f32 %v1894_v42, %v1878_v48 }
 0x323   :  { %v1942_v26 = vsel %vm1926_vm2, %v1910_v15, 0.0 }
 0x324   :  { %1958 = vst.msk [vmem:[%s3866_s8 + $0x70] sm:$0xff] %vm34_vm1, %v1942_v26 }

</bundles_post_ra>
